<compile_context>
chip_gen: v7x
topology: tpu7x:2x2x1
jax: 0.10.0
libtpu: 0.0.40
codegen_flags: <defaults>
</compile_context>

<pallas_src>
import numpy as np

import jax
import jax.numpy as jnp
from jax import lax
from jax.experimental import pallas as pl
from jax.experimental.pallas import tpu as pltpu

C1, C2 = 18, 36        # real channel counts
C1P, C2P = 24, 40      # padded to sublane multiples of 8


# ---------------------------------------------------------------------------
# The fused kernel: one batch tile (BT samples) per grid step.
# ---------------------------------------------------------------------------
def _cnn_kernel(cols_ref, w1_ref, b1_ref, msel_ref, w2_ref, b2_ref,
                mrow_ref, mcol_ref, msep_ref, wfc_ref, bfc_ref, out_ref):
    f32 = jnp.float32
    b1 = b1_ref[...]                                       # (C1P, 1)

    # ---- conv1 + ReLU fused with pool1 (2x2, stride 2) ---------------------
    # cols row = phase*4 + tap ; lanes = (b_in_tile, r, c) with r, c in [0, 8).
    # K = 4, so the contraction is four VPU FMAs per pool1 phase; pool1 is the
    # elementwise max over the four phases.
    p1 = None
    for p in range(4):                                     # pool1 phase pi*2+pj
        y = None
        for k in range(4):                                 # conv1 tap ki*2+kj
            t = w1_ref[k] * cols_ref[0, p * 4 + k:p * 4 + k + 1, :]   # (C1P, L1)
            y = t if y is None else y + t
        y = jnp.maximum(y + b1, 0.0)                       # ReLU
        p1 = y if p1 is None else jnp.maximum(p1, y)       # pool1
    # p1: (C1P, BT*64) -- pool1 output, channels on sublanes.

    # ---- conv2 (k=2, pad=1, stride=2) + ReLU -------------------------------
    # im2col is 4 one-hot lane gathers; the 4 taps are stacked along sublanes
    # so the channel contraction is a single K=4*C1P MXU matmul.
    a2 = jnp.concatenate(
        [jnp.dot(p1, msel_ref[k], preferred_element_type=f32) for k in range(4)],
        axis=0)                                            # (4*C1P, BT*25)
    y2 = jnp.dot(w2_ref[...], a2, preferred_element_type=f32) + b2_ref[...]
    y2 = jnp.maximum(y2, 0.0)                              # (C2P, BT*25), lanes (b, oh, ow)

    # ---- pool2 (3x3, stride 2), separable: row max then column max ---------
    rmax = None
    for d in range(3):
        g = jnp.dot(y2, mrow_ref[d], preferred_element_type=f32)      # (C2P, BT*10)
        rmax = g if rmax is None else jnp.maximum(rmax, g)
    pooled = None
    for d in range(3):
        g = jnp.dot(rmax, mcol_ref[d], preferred_element_type=f32)    # (C2P, 4*BT)
        pooled = g if pooled is None else jnp.maximum(pooled, g)
    # pooled lanes are ordered (s, b) with s = ph*2 + pw.

    # ---- NCHW flatten + fc1 as ONE fused K=4*C2P matmul --------------------
    feat = jnp.concatenate(
        [jnp.dot(pooled, msep_ref[s], preferred_element_type=f32) for s in range(4)],
        axis=0)                                            # (4*C2P, BT)
    out_ref[0] = jnp.dot(wfc_ref[...], feat, preferred_element_type=f32) + bfc_ref[...]


# ---------------------------------------------------------------------------
# Wrapper-side preparation (cheap, batch-tile-sized trace-time constants only)
# ---------------------------------------------------------------------------
def _conv1_cols(x, bt):
    """(B,1,28,28) -> (G, 16, bt*64) conv1 patches.
    Row = (pi*2+pj)*4 + (ki*2+kj); lane = b_in_tile*64 + r*8 + c."""
    B = x.shape[0]
    G = -(-B // bt)
    Bp = G * bt
    xp = jnp.pad(x[:, 0].astype(jnp.float32), ((0, Bp - B), (2, 2), (2, 2)))  # (Bp,32,32)
    xr = xp.reshape(Bp, 8, 2, 2, 8, 2, 2)              # (b, r, pi, ki, c, pj, kj)
    xr = xr.transpose(2, 5, 3, 6, 0, 1, 4)             # (pi, pj, ki, kj, b, r, c)
    cols = xr.reshape(16, G, bt * 64)
    return cols.transpose(1, 0, 2)                     # (G, 16, bt*64)


def _selection_mats(bt):
    """One-hot gather matrices; size depends only on the batch tile bt."""
    L1, L2, L3, L4 = bt * 64, bt * 25, bt * 10, bt * 4
    # conv2 im2col (pad=1, stride=2): tap (ki,kj) of output (oh,ow) reads
    # p1[2*oh+ki-1, 2*ow+kj-1] (zero outside [0,8) -> all-zero column).
    msel = np.zeros((4, L1, L2), np.float32)
    for ki in range(2):
        for kj in range(2):
            k = ki * 2 + kj
            for b in range(bt):
                for oh in range(5):
                    for ow in range(5):
                        r, c = 2 * oh + ki - 1, 2 * ow + kj - 1
                        if 0 <= r < 8 and 0 <= c < 8:
                            msel[k, b * 64 + r * 8 + c, b * 25 + oh * 5 + ow] = 1.0
    # pool2 row gather: (b, ph, ow) <- y2[b, 2*ph+di, ow]
    mrow = np.zeros((3, L2, L3), np.float32)
    for di in range(3):
        for b in range(bt):
            for ph in range(2):
                for ow in range(5):
                    mrow[di, b * 25 + (2 * ph + di) * 5 + ow, b * 10 + ph * 5 + ow] = 1.0
    # pool2 column gather + compaction to lanes (s, b): s = ph*2 + pw
    mcol = np.zeros((3, L3, L4), np.float32)
    for dj in range(3):
        for b in range(bt):
            for ph in range(2):
                for pw in range(2):
                    s = ph * 2 + pw
                    mcol[dj, b * 10 + ph * 5 + (2 * pw + dj), s * bt + b] = 1.0
    # per-position separator: q_s[:, b] = pooled[:, s*bt + b]
    msep = np.zeros((4, L4, bt), np.float32)
    for s in range(4):
        for b in range(bt):
            msep[s, s * bt + b, b] = 1.0
    return msel, mrow, mcol, msep


def _prep_params(params):
    """Re-layout weights: channel padding 18->24 / 36->40, tap / position
    stacking so conv2 and fc1 are each a single matmul."""
    w1 = params["w1"].astype(jnp.float32).reshape(C1, 4)            # [o, ki*2+kj]
    w1p = jnp.zeros((4, C1P, 1), jnp.float32).at[:, :C1, 0].set(w1.T)
    b1p = jnp.zeros((C1P, 1), jnp.float32).at[:C1, 0].set(params["b1"].astype(jnp.float32))

    w2 = params["w2"].astype(jnp.float32).reshape(C2, C1, 4)        # [o, c, k]
    w2s = jnp.zeros((C2P, 4, C1P), jnp.float32).at[:C2, :, :C1].set(
        jnp.transpose(w2, (0, 2, 1)))
    w2s = w2s.reshape(C2P, 4 * C1P)                                  # [o, k*C1P + c]
    b2p = jnp.zeros((C2P, 1), jnp.float32).at[:C2, 0].set(params["b2"].astype(jnp.float32))

    wfc = params["wfc"].astype(jnp.float32).reshape(10, C2, 4)       # [o, c, s] (NCHW flatten)
    wfcs = jnp.zeros((10, 4, C2P), jnp.float32).at[:, :, :C2].set(
        jnp.transpose(wfc, (0, 2, 1)))
    wfcs = wfcs.reshape(10, 4 * C2P)                                 # [o, s*C2P + c]
    bfcp = params["bfc"].astype(jnp.float32).reshape(10, 1)
    return w1p, b1p, w2s, b2p, wfcs, bfcp


def cnn_forward(x, params, bt=2):
    """Forward pass; batch is tiled by `bt` onto a parallel grid axis.
    bt=2 keeps the conv1/pool1 stage at exactly 128 lanes; raise bt (e.g. 8-16)
    for larger batches to keep the tail lane-dense."""
    B = x.shape[0]
    G = -(-B // bt)
    cols = _conv1_cols(x, bt)                                        # (G, 16, bt*64)
    msel, mrow, mcol, msep = _selection_mats(bt)
    w1p, b1p, w2s, b2p, wfcs, bfcp = _prep_params(params)

    inputs = (cols, w1p, b1p, jnp.asarray(msel), w2s, b2p,
              jnp.asarray(mrow), jnp.asarray(mcol), jnp.asarray(msep), wfcs, bfcp)

    def _const_spec(a):
        # Full-array block, constant index map -> copied into VMEM once.
        return pl.BlockSpec(a.shape, lambda g, _z=(0,) * a.ndim: _z)

    in_specs = [pl.BlockSpec((1, 16, bt * 64), lambda g: (g, 0, 0))]
    in_specs += [_const_spec(a) for a in inputs[1:]]

    out = pl.pallas_call(
        _cnn_kernel,
        out_shape=jax.ShapeDtypeStruct((G, 10, bt), jnp.float32),
        grid=(G,),
        in_specs=in_specs,
        out_specs=pl.BlockSpec((1, 10, bt), lambda g: (g, 0, 0)),
        compiler_params=pltpu.CompilerParams(
            dimension_semantics=("parallel",),          # both v7x TCs get batch tiles
            vmem_limit_bytes=32 * 1024 * 1024,          # explicit scoped-VMEM budget
        ),
    )(*inputs)
    # (G, 10, bt) -> (B, 10)
    return out.transpose(0, 2, 1).reshape(G * bt, 10)[:B]


# ---------------------------------------------------------------------------
# Pure-XLA reference (matches the PyTorch module) for a sanity check
# ---------------------------------------------------------------------------
def _reference_forward(x, params):
    neg_inf = jnp.array(-jnp.inf, jnp.float32)
    y = lax.conv_general_dilated(x, params["w1"], (2, 2), ((2, 2), (2, 2)),
                                 dimension_numbers=("NCHW", "OIHW", "NCHW"))
    y = jax.nn.relu(y + params["b1"][None, :, None, None])
    y = lax.reduce_window(y, neg_inf, lax.max, (1, 1, 2, 2), (1, 1, 2, 2), "VALID")
    y = lax.conv_general_dilated(y, params["w2"], (2, 2), ((1, 1), (1, 1)),
                                 dimension_numbers=("NCHW", "OIHW", "NCHW"))
    y = jax.nn.relu(y + params["b2"][None, :, None, None])
    y = lax.reduce_window(y, neg_inf, lax.max, (1, 1, 3, 3), (1, 1, 2, 2), "VALID")
    flat = y.reshape(y.shape[0], -1)
    return flat @ params["wfc"].T + params["bfc"]


if __name__ == "__main__":
    key = jax.random.PRNGKey(0)
    ks = jax.random.split(key, 7)
    params = {
        "w1": jax.random.normal(ks[0], (18, 1, 2, 2), jnp.float32) * 0.1,
        "b1": jax.random.normal(ks[1], (18,), jnp.float32) * 0.1,
        "w2": jax.random.normal(ks[2], (36, 18, 2, 2), jnp.float32) * 0.1,
        "b2": jax.random.normal(ks[3], (36,), jnp.float32) * 0.1,
        "wfc": jax.random.normal(ks[4], (10, 144), jnp.float32) * 0.1,
        "bfc": jax.random.normal(ks[5], (10,), jnp.float32) * 0.1,
    }
    # 28x28 input so the flattened feature count is 144 = 36*2*2 (fc1 in_features).
    # Batch 5 is deliberately not a multiple of the batch tile (2): exercises
    # batch padding and the multi-step parallel grid.
    x = jax.random.normal(ks[6], (5, 1, 28, 28), jnp.float32)

    out = jax.block_until_ready(jax.jit(cnn_forward)(x, params))
    assert out.shape == (5, 10) and out.dtype == jnp.float32, (out.shape, out.dtype)

    ref = _reference_forward(x, params)
    assert jnp.allclose(out, ref, atol=5e-2, rtol=5e-2), (out, ref)
    print("KERNEL_OK")
</pallas_src>

<mosaic_0001>
module attributes {stable_mosaic.version = 11 : i64} {
  func.func @_cnn_kernel(%arg0: i32, %arg1: memref<1x16x128xf32, #tpu.memory_space<vmem>>, %arg2: memref<4x24x1xf32, #tpu.memory_space<vmem>>, %arg3: memref<24x1xf32, #tpu.memory_space<vmem>>, %arg4: memref<4x128x50xf32, #tpu.memory_space<vmem>>, %arg5: memref<40x96xf32, #tpu.memory_space<vmem>>, %arg6: memref<40x1xf32, #tpu.memory_space<vmem>>, %arg7: memref<3x50x20xf32, #tpu.memory_space<vmem>>, %arg8: memref<3x20x8xf32, #tpu.memory_space<vmem>>, %arg9: memref<4x8x2xf32, #tpu.memory_space<vmem>>, %arg10: memref<10x160xf32, #tpu.memory_space<vmem>>, %arg11: memref<10x1xf32, #tpu.memory_space<vmem>>, %arg12: memref<1x10x2xf32, #tpu.memory_space<vmem>>) attributes {dimension_semantics = [#tpu.dimension_semantics<parallel>], iteration_bounds = array<i64: 3>, scalar_prefetch = 0 : i64, scratch_operands = 0 : i64, tpu.core_type = #tpu.core_type<tc>, window_params = [{transform_indices = @transform_0, window_bounds = array<i64: 1, 16, 128>}, {pipeline_mode = #tpu.pipeline_mode<synchronous>, transform_indices = @transform_1, window_bounds = array<i64: 4, 24, 1>}, {pipeline_mode = #tpu.pipeline_mode<synchronous>, transform_indices = @transform_2, window_bounds = array<i64: 24, 1>}, {pipeline_mode = #tpu.pipeline_mode<synchronous>, transform_indices = @transform_3, window_bounds = array<i64: 4, 128, 50>}, {pipeline_mode = #tpu.pipeline_mode<synchronous>, transform_indices = @transform_4, window_bounds = array<i64: 40, 96>}, {pipeline_mode = #tpu.pipeline_mode<synchronous>, transform_indices = @transform_5, window_bounds = array<i64: 40, 1>}, {pipeline_mode = #tpu.pipeline_mode<synchronous>, transform_indices = @transform_6, window_bounds = array<i64: 3, 50, 20>}, {pipeline_mode = #tpu.pipeline_mode<synchronous>, transform_indices = @transform_7, window_bounds = array<i64: 3, 20, 8>}, {pipeline_mode = #tpu.pipeline_mode<synchronous>, transform_indices = @transform_8, window_bounds = array<i64: 4, 8, 2>}, {pipeline_mode = #tpu.pipeline_mode<synchronous>, transform_indices = @transform_9, window_bounds = array<i64: 10, 160>}, {pipeline_mode = #tpu.pipeline_mode<synchronous>, transform_indices = @transform_10, window_bounds = array<i64: 10, 1>}, {transform_indices = @transform_11, window_bounds = array<i64: 1, 10, 2>}]} {
    %c0 = arith.constant 0 : index
    %c0_0 = arith.constant 0 : index
    %0 = vector.load %arg3[%c0, %c0_0] : memref<24x1xf32, #tpu.memory_space<vmem>>, vector<24x1xf32>
    %c0_1 = arith.constant 0 : index
    %c0_2 = arith.constant 0 : index
    %c0_3 = arith.constant 0 : index
    %1 = vector.load %arg2[%c0_1, %c0_2, %c0_3] : memref<4x24x1xf32, #tpu.memory_space<vmem>>, vector<1x24x1xf32>
    %2 = vector.shape_cast %1 : vector<1x24x1xf32> to vector<24x1xf32>
    %c0_4 = arith.constant 0 : index
    %c0_5 = arith.constant 0 : index
    %c0_6 = arith.constant 0 : index
    %3 = vector.load %arg1[%c0_4, %c0_5, %c0_6] : memref<1x16x128xf32, #tpu.memory_space<vmem>>, vector<1x1x128xf32>
    %4 = vector.shape_cast %3 : vector<1x1x128xf32> to vector<1x128xf32>
    %5 = vector.broadcast %2 : vector<24x1xf32> to vector<24x128xf32>
    %6 = vector.broadcast %4 : vector<1x128xf32> to vector<24x128xf32>
    %7 = arith.mulf %5, %6 : vector<24x128xf32>
    %c1 = arith.constant 1 : index
    %c0_7 = arith.constant 0 : index
    %c0_8 = arith.constant 0 : index
    %8 = vector.load %arg2[%c1, %c0_7, %c0_8] : memref<4x24x1xf32, #tpu.memory_space<vmem>>, vector<1x24x1xf32>
    %9 = vector.shape_cast %8 : vector<1x24x1xf32> to vector<24x1xf32>
    %c0_9 = arith.constant 0 : index
    %c1_10 = arith.constant 1 : index
    %c0_11 = arith.constant 0 : index
    %10 = vector.load %arg1[%c0_9, %c1_10, %c0_11] : memref<1x16x128xf32, #tpu.memory_space<vmem>>, vector<1x1x128xf32>
    %11 = vector.shape_cast %10 : vector<1x1x128xf32> to vector<1x128xf32>
    %12 = vector.broadcast %9 : vector<24x1xf32> to vector<24x128xf32>
    %13 = vector.broadcast %11 : vector<1x128xf32> to vector<24x128xf32>
    %14 = arith.mulf %12, %13 : vector<24x128xf32>
    %15 = arith.addf %7, %14 : vector<24x128xf32>
    %c2 = arith.constant 2 : index
    %c0_12 = arith.constant 0 : index
    %c0_13 = arith.constant 0 : index
    %16 = vector.load %arg2[%c2, %c0_12, %c0_13] : memref<4x24x1xf32, #tpu.memory_space<vmem>>, vector<1x24x1xf32>
    %17 = vector.shape_cast %16 : vector<1x24x1xf32> to vector<24x1xf32>
    %c0_14 = arith.constant 0 : index
    %c2_15 = arith.constant 2 : index
    %c0_16 = arith.constant 0 : index
    %18 = vector.load %arg1[%c0_14, %c2_15, %c0_16] : memref<1x16x128xf32, #tpu.memory_space<vmem>>, vector<1x1x128xf32>
    %19 = vector.shape_cast %18 : vector<1x1x128xf32> to vector<1x128xf32>
    %20 = vector.broadcast %17 : vector<24x1xf32> to vector<24x128xf32>
    %21 = vector.broadcast %19 : vector<1x128xf32> to vector<24x128xf32>
    %22 = arith.mulf %20, %21 : vector<24x128xf32>
    %23 = arith.addf %15, %22 : vector<24x128xf32>
    %c3 = arith.constant 3 : index
    %c0_17 = arith.constant 0 : index
    %c0_18 = arith.constant 0 : index
    %24 = vector.load %arg2[%c3, %c0_17, %c0_18] : memref<4x24x1xf32, #tpu.memory_space<vmem>>, vector<1x24x1xf32>
    %25 = vector.shape_cast %24 : vector<1x24x1xf32> to vector<24x1xf32>
    %c0_19 = arith.constant 0 : index
    %c3_20 = arith.constant 3 : index
    %c0_21 = arith.constant 0 : index
    %26 = vector.load %arg1[%c0_19, %c3_20, %c0_21] : memref<1x16x128xf32, #tpu.memory_space<vmem>>, vector<1x1x128xf32>
    %27 = vector.shape_cast %26 : vector<1x1x128xf32> to vector<1x128xf32>
    %28 = vector.broadcast %25 : vector<24x1xf32> to vector<24x128xf32>
    %29 = vector.broadcast %27 : vector<1x128xf32> to vector<24x128xf32>
    %30 = arith.mulf %28, %29 : vector<24x128xf32>
    %31 = arith.addf %23, %30 : vector<24x128xf32>
    %32 = vector.broadcast %0 : vector<24x1xf32> to vector<24x128xf32>
    %33 = arith.addf %31, %32 : vector<24x128xf32>
    %cst = arith.constant 0.000000e+00 : f32
    %34 = vector.broadcast %cst : f32 to vector<24x128xf32>
    %35 = arith.maximumf %33, %34 : vector<24x128xf32>
    %c0_22 = arith.constant 0 : index
    %c0_23 = arith.constant 0 : index
    %c0_24 = arith.constant 0 : index
    %36 = vector.load %arg2[%c0_22, %c0_23, %c0_24] : memref<4x24x1xf32, #tpu.memory_space<vmem>>, vector<1x24x1xf32>
    %37 = vector.shape_cast %36 : vector<1x24x1xf32> to vector<24x1xf32>
    %c0_25 = arith.constant 0 : index
    %c4 = arith.constant 4 : index
    %c0_26 = arith.constant 0 : index
    %38 = vector.load %arg1[%c0_25, %c4, %c0_26] : memref<1x16x128xf32, #tpu.memory_space<vmem>>, vector<1x1x128xf32>
    %39 = vector.shape_cast %38 : vector<1x1x128xf32> to vector<1x128xf32>
    %40 = vector.broadcast %37 : vector<24x1xf32> to vector<24x128xf32>
    %41 = vector.broadcast %39 : vector<1x128xf32> to vector<24x128xf32>
    %42 = arith.mulf %40, %41 : vector<24x128xf32>
    %c1_27 = arith.constant 1 : index
    %c0_28 = arith.constant 0 : index
    %c0_29 = arith.constant 0 : index
    %43 = vector.load %arg2[%c1_27, %c0_28, %c0_29] : memref<4x24x1xf32, #tpu.memory_space<vmem>>, vector<1x24x1xf32>
    %44 = vector.shape_cast %43 : vector<1x24x1xf32> to vector<24x1xf32>
    %c0_30 = arith.constant 0 : index
    %c5 = arith.constant 5 : index
    %c0_31 = arith.constant 0 : index
    %45 = vector.load %arg1[%c0_30, %c5, %c0_31] : memref<1x16x128xf32, #tpu.memory_space<vmem>>, vector<1x1x128xf32>
    %46 = vector.shape_cast %45 : vector<1x1x128xf32> to vector<1x128xf32>
    %47 = vector.broadcast %44 : vector<24x1xf32> to vector<24x128xf32>
    %48 = vector.broadcast %46 : vector<1x128xf32> to vector<24x128xf32>
    %49 = arith.mulf %47, %48 : vector<24x128xf32>
    %50 = arith.addf %42, %49 : vector<24x128xf32>
    %c2_32 = arith.constant 2 : index
    %c0_33 = arith.constant 0 : index
    %c0_34 = arith.constant 0 : index
    %51 = vector.load %arg2[%c2_32, %c0_33, %c0_34] : memref<4x24x1xf32, #tpu.memory_space<vmem>>, vector<1x24x1xf32>
    %52 = vector.shape_cast %51 : vector<1x24x1xf32> to vector<24x1xf32>
    %c0_35 = arith.constant 0 : index
    %c6 = arith.constant 6 : index
    %c0_36 = arith.constant 0 : index
    %53 = vector.load %arg1[%c0_35, %c6, %c0_36] : memref<1x16x128xf32, #tpu.memory_space<vmem>>, vector<1x1x128xf32>
    %54 = vector.shape_cast %53 : vector<1x1x128xf32> to vector<1x128xf32>
    %55 = vector.broadcast %52 : vector<24x1xf32> to vector<24x128xf32>
    %56 = vector.broadcast %54 : vector<1x128xf32> to vector<24x128xf32>
    %57 = arith.mulf %55, %56 : vector<24x128xf32>
    %58 = arith.addf %50, %57 : vector<24x128xf32>
    %c3_37 = arith.constant 3 : index
    %c0_38 = arith.constant 0 : index
    %c0_39 = arith.constant 0 : index
    %59 = vector.load %arg2[%c3_37, %c0_38, %c0_39] : memref<4x24x1xf32, #tpu.memory_space<vmem>>, vector<1x24x1xf32>
    %60 = vector.shape_cast %59 : vector<1x24x1xf32> to vector<24x1xf32>
    %c0_40 = arith.constant 0 : index
    %c7 = arith.constant 7 : index
    %c0_41 = arith.constant 0 : index
    %61 = vector.load %arg1[%c0_40, %c7, %c0_41] : memref<1x16x128xf32, #tpu.memory_space<vmem>>, vector<1x1x128xf32>
    %62 = vector.shape_cast %61 : vector<1x1x128xf32> to vector<1x128xf32>
    %63 = vector.broadcast %60 : vector<24x1xf32> to vector<24x128xf32>
    %64 = vector.broadcast %62 : vector<1x128xf32> to vector<24x128xf32>
    %65 = arith.mulf %63, %64 : vector<24x128xf32>
    %66 = arith.addf %58, %65 : vector<24x128xf32>
    %67 = vector.broadcast %0 : vector<24x1xf32> to vector<24x128xf32>
    %68 = arith.addf %66, %67 : vector<24x128xf32>
    %cst_42 = arith.constant 0.000000e+00 : f32
    %69 = vector.broadcast %cst_42 : f32 to vector<24x128xf32>
    %70 = arith.maximumf %68, %69 : vector<24x128xf32>
    %71 = arith.maximumf %35, %70 : vector<24x128xf32>
    %c0_43 = arith.constant 0 : index
    %c0_44 = arith.constant 0 : index
    %c0_45 = arith.constant 0 : index
    %72 = vector.load %arg2[%c0_43, %c0_44, %c0_45] : memref<4x24x1xf32, #tpu.memory_space<vmem>>, vector<1x24x1xf32>
    %73 = vector.shape_cast %72 : vector<1x24x1xf32> to vector<24x1xf32>
    %c0_46 = arith.constant 0 : index
    %c8 = arith.constant 8 : index
    %c0_47 = arith.constant 0 : index
    %74 = vector.load %arg1[%c0_46, %c8, %c0_47] : memref<1x16x128xf32, #tpu.memory_space<vmem>>, vector<1x1x128xf32>
    %75 = vector.shape_cast %74 : vector<1x1x128xf32> to vector<1x128xf32>
    %76 = vector.broadcast %73 : vector<24x1xf32> to vector<24x128xf32>
    %77 = vector.broadcast %75 : vector<1x128xf32> to vector<24x128xf32>
    %78 = arith.mulf %76, %77 : vector<24x128xf32>
    %c1_48 = arith.constant 1 : index
    %c0_49 = arith.constant 0 : index
    %c0_50 = arith.constant 0 : index
    %79 = vector.load %arg2[%c1_48, %c0_49, %c0_50] : memref<4x24x1xf32, #tpu.memory_space<vmem>>, vector<1x24x1xf32>
    %80 = vector.shape_cast %79 : vector<1x24x1xf32> to vector<24x1xf32>
    %c0_51 = arith.constant 0 : index
    %c9 = arith.constant 9 : index
    %c0_52 = arith.constant 0 : index
    %81 = vector.load %arg1[%c0_51, %c9, %c0_52] : memref<1x16x128xf32, #tpu.memory_space<vmem>>, vector<1x1x128xf32>
    %82 = vector.shape_cast %81 : vector<1x1x128xf32> to vector<1x128xf32>
    %83 = vector.broadcast %80 : vector<24x1xf32> to vector<24x128xf32>
    %84 = vector.broadcast %82 : vector<1x128xf32> to vector<24x128xf32>
    %85 = arith.mulf %83, %84 : vector<24x128xf32>
    %86 = arith.addf %78, %85 : vector<24x128xf32>
    %c2_53 = arith.constant 2 : index
    %c0_54 = arith.constant 0 : index
    %c0_55 = arith.constant 0 : index
    %87 = vector.load %arg2[%c2_53, %c0_54, %c0_55] : memref<4x24x1xf32, #tpu.memory_space<vmem>>, vector<1x24x1xf32>
    %88 = vector.shape_cast %87 : vector<1x24x1xf32> to vector<24x1xf32>
    %c0_56 = arith.constant 0 : index
    %c10 = arith.constant 10 : index
    %c0_57 = arith.constant 0 : index
    %89 = vector.load %arg1[%c0_56, %c10, %c0_57] : memref<1x16x128xf32, #tpu.memory_space<vmem>>, vector<1x1x128xf32>
    %90 = vector.shape_cast %89 : vector<1x1x128xf32> to vector<1x128xf32>
    %91 = vector.broadcast %88 : vector<24x1xf32> to vector<24x128xf32>
    %92 = vector.broadcast %90 : vector<1x128xf32> to vector<24x128xf32>
    %93 = arith.mulf %91, %92 : vector<24x128xf32>
    %94 = arith.addf %86, %93 : vector<24x128xf32>
    %c3_58 = arith.constant 3 : index
    %c0_59 = arith.constant 0 : index
    %c0_60 = arith.constant 0 : index
    %95 = vector.load %arg2[%c3_58, %c0_59, %c0_60] : memref<4x24x1xf32, #tpu.memory_space<vmem>>, vector<1x24x1xf32>
    %96 = vector.shape_cast %95 : vector<1x24x1xf32> to vector<24x1xf32>
    %c0_61 = arith.constant 0 : index
    %c11 = arith.constant 11 : index
    %c0_62 = arith.constant 0 : index
    %97 = vector.load %arg1[%c0_61, %c11, %c0_62] : memref<1x16x128xf32, #tpu.memory_space<vmem>>, vector<1x1x128xf32>
    %98 = vector.shape_cast %97 : vector<1x1x128xf32> to vector<1x128xf32>
    %99 = vector.broadcast %96 : vector<24x1xf32> to vector<24x128xf32>
    %100 = vector.broadcast %98 : vector<1x128xf32> to vector<24x128xf32>
    %101 = arith.mulf %99, %100 : vector<24x128xf32>
    %102 = arith.addf %94, %101 : vector<24x128xf32>
    %103 = vector.broadcast %0 : vector<24x1xf32> to vector<24x128xf32>
    %104 = arith.addf %102, %103 : vector<24x128xf32>
    %cst_63 = arith.constant 0.000000e+00 : f32
    %105 = vector.broadcast %cst_63 : f32 to vector<24x128xf32>
    %106 = arith.maximumf %104, %105 : vector<24x128xf32>
    %107 = arith.maximumf %71, %106 : vector<24x128xf32>
    %c0_64 = arith.constant 0 : index
    %c0_65 = arith.constant 0 : index
    %c0_66 = arith.constant 0 : index
    %108 = vector.load %arg2[%c0_64, %c0_65, %c0_66] : memref<4x24x1xf32, #tpu.memory_space<vmem>>, vector<1x24x1xf32>
    %109 = vector.shape_cast %108 : vector<1x24x1xf32> to vector<24x1xf32>
    %c0_67 = arith.constant 0 : index
    %c12 = arith.constant 12 : index
    %c0_68 = arith.constant 0 : index
    %110 = vector.load %arg1[%c0_67, %c12, %c0_68] : memref<1x16x128xf32, #tpu.memory_space<vmem>>, vector<1x1x128xf32>
    %111 = vector.shape_cast %110 : vector<1x1x128xf32> to vector<1x128xf32>
    %112 = vector.broadcast %109 : vector<24x1xf32> to vector<24x128xf32>
    %113 = vector.broadcast %111 : vector<1x128xf32> to vector<24x128xf32>
    %114 = arith.mulf %112, %113 : vector<24x128xf32>
    %c1_69 = arith.constant 1 : index
    %c0_70 = arith.constant 0 : index
    %c0_71 = arith.constant 0 : index
    %115 = vector.load %arg2[%c1_69, %c0_70, %c0_71] : memref<4x24x1xf32, #tpu.memory_space<vmem>>, vector<1x24x1xf32>
    %116 = vector.shape_cast %115 : vector<1x24x1xf32> to vector<24x1xf32>
    %c0_72 = arith.constant 0 : index
    %c13 = arith.constant 13 : index
    %c0_73 = arith.constant 0 : index
    %117 = vector.load %arg1[%c0_72, %c13, %c0_73] : memref<1x16x128xf32, #tpu.memory_space<vmem>>, vector<1x1x128xf32>
    %118 = vector.shape_cast %117 : vector<1x1x128xf32> to vector<1x128xf32>
    %119 = vector.broadcast %116 : vector<24x1xf32> to vector<24x128xf32>
    %120 = vector.broadcast %118 : vector<1x128xf32> to vector<24x128xf32>
    %121 = arith.mulf %119, %120 : vector<24x128xf32>
    %122 = arith.addf %114, %121 : vector<24x128xf32>
    %c2_74 = arith.constant 2 : index
    %c0_75 = arith.constant 0 : index
    %c0_76 = arith.constant 0 : index
    %123 = vector.load %arg2[%c2_74, %c0_75, %c0_76] : memref<4x24x1xf32, #tpu.memory_space<vmem>>, vector<1x24x1xf32>
    %124 = vector.shape_cast %123 : vector<1x24x1xf32> to vector<24x1xf32>
    %c0_77 = arith.constant 0 : index
    %c14 = arith.constant 14 : index
    %c0_78 = arith.constant 0 : index
    %125 = vector.load %arg1[%c0_77, %c14, %c0_78] : memref<1x16x128xf32, #tpu.memory_space<vmem>>, vector<1x1x128xf32>
    %126 = vector.shape_cast %125 : vector<1x1x128xf32> to vector<1x128xf32>
    %127 = vector.broadcast %124 : vector<24x1xf32> to vector<24x128xf32>
    %128 = vector.broadcast %126 : vector<1x128xf32> to vector<24x128xf32>
    %129 = arith.mulf %127, %128 : vector<24x128xf32>
    %130 = arith.addf %122, %129 : vector<24x128xf32>
    %c3_79 = arith.constant 3 : index
    %c0_80 = arith.constant 0 : index
    %c0_81 = arith.constant 0 : index
    %131 = vector.load %arg2[%c3_79, %c0_80, %c0_81] : memref<4x24x1xf32, #tpu.memory_space<vmem>>, vector<1x24x1xf32>
    %132 = vector.shape_cast %131 : vector<1x24x1xf32> to vector<24x1xf32>
    %c0_82 = arith.constant 0 : index
    %c15 = arith.constant 15 : index
    %c0_83 = arith.constant 0 : index
    %133 = vector.load %arg1[%c0_82, %c15, %c0_83] : memref<1x16x128xf32, #tpu.memory_space<vmem>>, vector<1x1x128xf32>
    %134 = vector.shape_cast %133 : vector<1x1x128xf32> to vector<1x128xf32>
    %135 = vector.broadcast %132 : vector<24x1xf32> to vector<24x128xf32>
    %136 = vector.broadcast %134 : vector<1x128xf32> to vector<24x128xf32>
    %137 = arith.mulf %135, %136 : vector<24x128xf32>
    %138 = arith.addf %130, %137 : vector<24x128xf32>
    %139 = vector.broadcast %0 : vector<24x1xf32> to vector<24x128xf32>
    %140 = arith.addf %138, %139 : vector<24x128xf32>
    %cst_84 = arith.constant 0.000000e+00 : f32
    %141 = vector.broadcast %cst_84 : f32 to vector<24x128xf32>
    %142 = arith.maximumf %140, %141 : vector<24x128xf32>
    %143 = arith.maximumf %107, %142 : vector<24x128xf32>
    %c0_85 = arith.constant 0 : index
    %c0_86 = arith.constant 0 : index
    %c0_87 = arith.constant 0 : index
    %144 = vector.load %arg4[%c0_85, %c0_86, %c0_87] : memref<4x128x50xf32, #tpu.memory_space<vmem>>, vector<1x128x50xf32>
    %145 = vector.shape_cast %144 : vector<1x128x50xf32> to vector<128x50xf32>
    %cst_88 = arith.constant dense<0.000000e+00> : vector<24x50xf32>
    %146 = tpu.matmul %143, %145, %cst_88 {dimension_numbers = #tpu.dot_dimension_numbers<[1], [0], [0], [1], [0, 0, 1, 1], [], []>} : vector<24x128xf32>, vector<128x50xf32>, vector<24x50xf32> -> vector<24x50xf32>
    %c1_89 = arith.constant 1 : index
    %c0_90 = arith.constant 0 : index
    %c0_91 = arith.constant 0 : index
    %147 = vector.load %arg4[%c1_89, %c0_90, %c0_91] : memref<4x128x50xf32, #tpu.memory_space<vmem>>, vector<1x128x50xf32>
    %148 = vector.shape_cast %147 : vector<1x128x50xf32> to vector<128x50xf32>
    %cst_92 = arith.constant dense<0.000000e+00> : vector<24x50xf32>
    %149 = tpu.matmul %143, %148, %cst_92 {dimension_numbers = #tpu.dot_dimension_numbers<[1], [0], [0], [1], [0, 0, 1, 1], [], []>} : vector<24x128xf32>, vector<128x50xf32>, vector<24x50xf32> -> vector<24x50xf32>
    %c2_93 = arith.constant 2 : index
    %c0_94 = arith.constant 0 : index
    %c0_95 = arith.constant 0 : index
    %150 = vector.load %arg4[%c2_93, %c0_94, %c0_95] : memref<4x128x50xf32, #tpu.memory_space<vmem>>, vector<1x128x50xf32>
    %151 = vector.shape_cast %150 : vector<1x128x50xf32> to vector<128x50xf32>
    %cst_96 = arith.constant dense<0.000000e+00> : vector<24x50xf32>
    %152 = tpu.matmul %143, %151, %cst_96 {dimension_numbers = #tpu.dot_dimension_numbers<[1], [0], [0], [1], [0, 0, 1, 1], [], []>} : vector<24x128xf32>, vector<128x50xf32>, vector<24x50xf32> -> vector<24x50xf32>
    %c3_97 = arith.constant 3 : index
    %c0_98 = arith.constant 0 : index
    %c0_99 = arith.constant 0 : index
    %153 = vector.load %arg4[%c3_97, %c0_98, %c0_99] : memref<4x128x50xf32, #tpu.memory_space<vmem>>, vector<1x128x50xf32>
    %154 = vector.shape_cast %153 : vector<1x128x50xf32> to vector<128x50xf32>
    %cst_100 = arith.constant dense<0.000000e+00> : vector<24x50xf32>
    %155 = tpu.matmul %143, %154, %cst_100 {dimension_numbers = #tpu.dot_dimension_numbers<[1], [0], [0], [1], [0, 0, 1, 1], [], []>} : vector<24x128xf32>, vector<128x50xf32>, vector<24x50xf32> -> vector<24x50xf32>
    %156 = tpu.concatenate %146, %149, %152, %155 in 0 : vector<24x50xf32>, vector<24x50xf32>, vector<24x50xf32>, vector<24x50xf32> -> vector<96x50xf32>
    %c0_101 = arith.constant 0 : index
    %c0_102 = arith.constant 0 : index
    %157 = vector.load %arg5[%c0_101, %c0_102] : memref<40x96xf32, #tpu.memory_space<vmem>>, vector<40x96xf32>
    %cst_103 = arith.constant dense<0.000000e+00> : vector<40x50xf32>
    %158 = tpu.matmul %157, %156, %cst_103 {dimension_numbers = #tpu.dot_dimension_numbers<[1], [0], [0], [1], [0, 0, 1, 1], [], []>} : vector<40x96xf32>, vector<96x50xf32>, vector<40x50xf32> -> vector<40x50xf32>
    %c0_104 = arith.constant 0 : index
    %c0_105 = arith.constant 0 : index
    %159 = vector.load %arg6[%c0_104, %c0_105] : memref<40x1xf32, #tpu.memory_space<vmem>>, vector<40x1xf32>
    %160 = vector.broadcast %159 : vector<40x1xf32> to vector<40x50xf32>
    %161 = arith.addf %158, %160 : vector<40x50xf32>
    %cst_106 = arith.constant 0.000000e+00 : f32
    %162 = vector.broadcast %cst_106 : f32 to vector<40x50xf32>
    %163 = arith.maximumf %161, %162 : vector<40x50xf32>
    %c0_107 = arith.constant 0 : index
    %c0_108 = arith.constant 0 : index
    %c0_109 = arith.constant 0 : index
    %164 = vector.load %arg7[%c0_107, %c0_108, %c0_109] : memref<3x50x20xf32, #tpu.memory_space<vmem>>, vector<1x50x20xf32>
    %165 = vector.shape_cast %164 : vector<1x50x20xf32> to vector<50x20xf32>
    %cst_110 = arith.constant dense<0.000000e+00> : vector<40x20xf32>
    %166 = tpu.matmul %163, %165, %cst_110 {dimension_numbers = #tpu.dot_dimension_numbers<[1], [0], [0], [1], [0, 0, 1, 1], [], []>} : vector<40x50xf32>, vector<50x20xf32>, vector<40x20xf32> -> vector<40x20xf32>
    %c1_111 = arith.constant 1 : index
    %c0_112 = arith.constant 0 : index
    %c0_113 = arith.constant 0 : index
    %167 = vector.load %arg7[%c1_111, %c0_112, %c0_113] : memref<3x50x20xf32, #tpu.memory_space<vmem>>, vector<1x50x20xf32>
    %168 = vector.shape_cast %167 : vector<1x50x20xf32> to vector<50x20xf32>
    %cst_114 = arith.constant dense<0.000000e+00> : vector<40x20xf32>
    %169 = tpu.matmul %163, %168, %cst_114 {dimension_numbers = #tpu.dot_dimension_numbers<[1], [0], [0], [1], [0, 0, 1, 1], [], []>} : vector<40x50xf32>, vector<50x20xf32>, vector<40x20xf32> -> vector<40x20xf32>
    %170 = arith.maximumf %166, %169 : vector<40x20xf32>
    %c2_115 = arith.constant 2 : index
    %c0_116 = arith.constant 0 : index
    %c0_117 = arith.constant 0 : index
    %171 = vector.load %arg7[%c2_115, %c0_116, %c0_117] : memref<3x50x20xf32, #tpu.memory_space<vmem>>, vector<1x50x20xf32>
    %172 = vector.shape_cast %171 : vector<1x50x20xf32> to vector<50x20xf32>
    %cst_118 = arith.constant dense<0.000000e+00> : vector<40x20xf32>
    %173 = tpu.matmul %163, %172, %cst_118 {dimension_numbers = #tpu.dot_dimension_numbers<[1], [0], [0], [1], [0, 0, 1, 1], [], []>} : vector<40x50xf32>, vector<50x20xf32>, vector<40x20xf32> -> vector<40x20xf32>
    %174 = arith.maximumf %170, %173 : vector<40x20xf32>
    %c0_119 = arith.constant 0 : index
    %c0_120 = arith.constant 0 : index
    %c0_121 = arith.constant 0 : index
    %175 = vector.load %arg8[%c0_119, %c0_120, %c0_121] : memref<3x20x8xf32, #tpu.memory_space<vmem>>, vector<1x20x8xf32>
    %176 = vector.shape_cast %175 : vector<1x20x8xf32> to vector<20x8xf32>
    %cst_122 = arith.constant dense<0.000000e+00> : vector<40x8xf32>
    %177 = tpu.matmul %174, %176, %cst_122 {dimension_numbers = #tpu.dot_dimension_numbers<[1], [0], [0], [1], [0, 0, 1, 1], [], []>} : vector<40x20xf32>, vector<20x8xf32>, vector<40x8xf32> -> vector<40x8xf32>
    %c1_123 = arith.constant 1 : index
    %c0_124 = arith.constant 0 : index
    %c0_125 = arith.constant 0 : index
    %178 = vector.load %arg8[%c1_123, %c0_124, %c0_125] : memref<3x20x8xf32, #tpu.memory_space<vmem>>, vector<1x20x8xf32>
    %179 = vector.shape_cast %178 : vector<1x20x8xf32> to vector<20x8xf32>
    %cst_126 = arith.constant dense<0.000000e+00> : vector<40x8xf32>
    %180 = tpu.matmul %174, %179, %cst_126 {dimension_numbers = #tpu.dot_dimension_numbers<[1], [0], [0], [1], [0, 0, 1, 1], [], []>} : vector<40x20xf32>, vector<20x8xf32>, vector<40x8xf32> -> vector<40x8xf32>
    %181 = arith.maximumf %177, %180 : vector<40x8xf32>
    %c2_127 = arith.constant 2 : index
    %c0_128 = arith.constant 0 : index
    %c0_129 = arith.constant 0 : index
    %182 = vector.load %arg8[%c2_127, %c0_128, %c0_129] : memref<3x20x8xf32, #tpu.memory_space<vmem>>, vector<1x20x8xf32>
    %183 = vector.shape_cast %182 : vector<1x20x8xf32> to vector<20x8xf32>
    %cst_130 = arith.constant dense<0.000000e+00> : vector<40x8xf32>
    %184 = tpu.matmul %174, %183, %cst_130 {dimension_numbers = #tpu.dot_dimension_numbers<[1], [0], [0], [1], [0, 0, 1, 1], [], []>} : vector<40x20xf32>, vector<20x8xf32>, vector<40x8xf32> -> vector<40x8xf32>
    %185 = arith.maximumf %181, %184 : vector<40x8xf32>
    %c0_131 = arith.constant 0 : index
    %c0_132 = arith.constant 0 : index
    %c0_133 = arith.constant 0 : index
    %186 = vector.load %arg9[%c0_131, %c0_132, %c0_133] : memref<4x8x2xf32, #tpu.memory_space<vmem>>, vector<1x8x2xf32>
    %187 = vector.shape_cast %186 : vector<1x8x2xf32> to vector<8x2xf32>
    %cst_134 = arith.constant dense<0.000000e+00> : vector<40x2xf32>
    %188 = tpu.matmul %185, %187, %cst_134 {dimension_numbers = #tpu.dot_dimension_numbers<[1], [0], [0], [1], [0, 0, 1, 1], [], []>} : vector<40x8xf32>, vector<8x2xf32>, vector<40x2xf32> -> vector<40x2xf32>
    %c1_135 = arith.constant 1 : index
    %c0_136 = arith.constant 0 : index
    %c0_137 = arith.constant 0 : index
    %189 = vector.load %arg9[%c1_135, %c0_136, %c0_137] : memref<4x8x2xf32, #tpu.memory_space<vmem>>, vector<1x8x2xf32>
    %190 = vector.shape_cast %189 : vector<1x8x2xf32> to vector<8x2xf32>
    %cst_138 = arith.constant dense<0.000000e+00> : vector<40x2xf32>
    %191 = tpu.matmul %185, %190, %cst_138 {dimension_numbers = #tpu.dot_dimension_numbers<[1], [0], [0], [1], [0, 0, 1, 1], [], []>} : vector<40x8xf32>, vector<8x2xf32>, vector<40x2xf32> -> vector<40x2xf32>
    %c2_139 = arith.constant 2 : index
    %c0_140 = arith.constant 0 : index
    %c0_141 = arith.constant 0 : index
    %192 = vector.load %arg9[%c2_139, %c0_140, %c0_141] : memref<4x8x2xf32, #tpu.memory_space<vmem>>, vector<1x8x2xf32>
    %193 = vector.shape_cast %192 : vector<1x8x2xf32> to vector<8x2xf32>
    %cst_142 = arith.constant dense<0.000000e+00> : vector<40x2xf32>
    %194 = tpu.matmul %185, %193, %cst_142 {dimension_numbers = #tpu.dot_dimension_numbers<[1], [0], [0], [1], [0, 0, 1, 1], [], []>} : vector<40x8xf32>, vector<8x2xf32>, vector<40x2xf32> -> vector<40x2xf32>
    %c3_143 = arith.constant 3 : index
    %c0_144 = arith.constant 0 : index
    %c0_145 = arith.constant 0 : index
    %195 = vector.load %arg9[%c3_143, %c0_144, %c0_145] : memref<4x8x2xf32, #tpu.memory_space<vmem>>, vector<1x8x2xf32>
    %196 = vector.shape_cast %195 : vector<1x8x2xf32> to vector<8x2xf32>
    %cst_146 = arith.constant dense<0.000000e+00> : vector<40x2xf32>
    %197 = tpu.matmul %185, %196, %cst_146 {dimension_numbers = #tpu.dot_dimension_numbers<[1], [0], [0], [1], [0, 0, 1, 1], [], []>} : vector<40x8xf32>, vector<8x2xf32>, vector<40x2xf32> -> vector<40x2xf32>
    %198 = tpu.concatenate %188, %191, %194, %197 in 0 : vector<40x2xf32>, vector<40x2xf32>, vector<40x2xf32>, vector<40x2xf32> -> vector<160x2xf32>
    %c0_147 = arith.constant 0 : index
    %c0_148 = arith.constant 0 : index
    %199 = vector.load %arg10[%c0_147, %c0_148] : memref<10x160xf32, #tpu.memory_space<vmem>>, vector<10x160xf32>
    %cst_149 = arith.constant dense<0.000000e+00> : vector<10x2xf32>
    %200 = tpu.matmul %199, %198, %cst_149 {dimension_numbers = #tpu.dot_dimension_numbers<[1], [0], [0], [1], [0, 0, 1, 1], [], []>} : vector<10x160xf32>, vector<160x2xf32>, vector<10x2xf32> -> vector<10x2xf32>
    %c0_150 = arith.constant 0 : index
    %c0_151 = arith.constant 0 : index
    %201 = vector.load %arg11[%c0_150, %c0_151] : memref<10x1xf32, #tpu.memory_space<vmem>>, vector<10x1xf32>
    %202 = vector.broadcast %201 : vector<10x1xf32> to vector<10x2xf32>
    %203 = arith.addf %200, %202 : vector<10x2xf32>
    %c0_152 = arith.constant 0 : index
    %c0_153 = arith.constant 0 : index
    %c0_154 = arith.constant 0 : index
    %204 = vector.load %arg12[%c0_152, %c0_153, %c0_154] : memref<1x10x2xf32, #tpu.memory_space<vmem>>, vector<1x10x2xf32>
    %205 = vector.shape_cast %204 : vector<1x10x2xf32> to vector<10x2xf32>
    %206 = vector.shape_cast %203 : vector<10x2xf32> to vector<1x10x2xf32>
    tpu.vector_store %arg12[%c0_152, %c0_153, %c0_154], %206 {strides = array<i32>} : memref<1x10x2xf32, #tpu.memory_space<vmem>>, vector<1x10x2xf32>,
    return
  }
  func.func @transform_0(%arg0: i32) -> (i32, i32, i32) {
    %c0_i32 = arith.constant 0 : i32
    %c0_i32_0 = arith.constant 0 : i32
    %c0_i32_1 = arith.constant 0 : i32
    return %arg0, %c0_i32, %c0_i32_0 : i32, i32, i32
  }
  func.func @transform_1(%arg0: i32) -> (i32, i32, i32) {
    %c0_i32 = arith.constant 0 : i32
    %c0_i32_0 = arith.constant 0 : i32
    %c0_i32_1 = arith.constant 0 : i32
    %c0_i32_2 = arith.constant 0 : i32
    return %c0_i32, %c0_i32_0, %c0_i32_1 : i32, i32, i32
  }
  func.func @transform_2(%arg0: i32) -> (i32, i32) {
    %c0_i32 = arith.constant 0 : i32
    %c0_i32_0 = arith.constant 0 : i32
    %c0_i32_1 = arith.constant 0 : i32
    return %c0_i32, %c0_i32_0 : i32, i32
  }
  func.func @transform_3(%arg0: i32) -> (i32, i32, i32) {
    %c0_i32 = arith.constant 0 : i32
    %c0_i32_0 = arith.constant 0 : i32
    %c0_i32_1 = arith.constant 0 : i32
    %c0_i32_2 = arith.constant 0 : i32
    return %c0_i32, %c0_i32_0, %c0_i32_1 : i32, i32, i32
  }
  func.func @transform_4(%arg0: i32) -> (i32, i32) {
    %c0_i32 = arith.constant 0 : i32
    %c0_i32_0 = arith.constant 0 : i32
    %c0_i32_1 = arith.constant 0 : i32
    return %c0_i32, %c0_i32_0 : i32, i32
  }
  func.func @transform_5(%arg0: i32) -> (i32, i32) {
    %c0_i32 = arith.constant 0 : i32
    %c0_i32_0 = arith.constant 0 : i32
    %c0_i32_1 = arith.constant 0 : i32
    return %c0_i32, %c0_i32_0 : i32, i32
  }
  func.func @transform_6(%arg0: i32) -> (i32, i32, i32) {
    %c0_i32 = arith.constant 0 : i32
    %c0_i32_0 = arith.constant 0 : i32
    %c0_i32_1 = arith.constant 0 : i32
    %c0_i32_2 = arith.constant 0 : i32
    return %c0_i32, %c0_i32_0, %c0_i32_1 : i32, i32, i32
  }
  func.func @transform_7(%arg0: i32) -> (i32, i32, i32) {
    %c0_i32 = arith.constant 0 : i32
    %c0_i32_0 = arith.constant 0 : i32
    %c0_i32_1 = arith.constant 0 : i32
    %c0_i32_2 = arith.constant 0 : i32
    return %c0_i32, %c0_i32_0, %c0_i32_1 : i32, i32, i32
  }
  func.func @transform_8(%arg0: i32) -> (i32, i32, i32) {
    %c0_i32 = arith.constant 0 : i32
    %c0_i32_0 = arith.constant 0 : i32
    %c0_i32_1 = arith.constant 0 : i32
    %c0_i32_2 = arith.constant 0 : i32
    return %c0_i32, %c0_i32_0, %c0_i32_1 : i32, i32, i32
  }
  func.func @transform_9(%arg0: i32) -> (i32, i32) {
    %c0_i32 = arith.constant 0 : i32
    %c0_i32_0 = arith.constant 0 : i32
    %c0_i32_1 = arith.constant 0 : i32
    return %c0_i32, %c0_i32_0 : i32, i32
  }
  func.func @transform_10(%arg0: i32) -> (i32, i32) {
    %c0_i32 = arith.constant 0 : i32
    %c0_i32_0 = arith.constant 0 : i32
    %c0_i32_1 = arith.constant 0 : i32
    return %c0_i32, %c0_i32_0 : i32, i32
  }
  func.func @transform_11(%arg0: i32) -> (i32, i32, i32) {
    %c0_i32 = arith.constant 0 : i32
    %c0_i32_0 = arith.constant 0 : i32
    %c0_i32_1 = arith.constant 0 : i32
    return %arg0, %c0_i32, %c0_i32_0 : i32, i32, i32
  }
}

</mosaic_0001>

<bundles_post_ra>
// kernel: cnn_forward.1
= control target key start
LH: loop header
LB: loop body
LE: loop exit
PB: predicated region body
PF: predicated region fallthrough
CT: control target
= control target key end

     0   :  { %s3440_s17 = smov 0   ;;  %s4289_s0 = inlined_call_operand.vmem [shape: f32[3,16,128], index: 0, kind: input, shape index: {}]   ;;  %s4290_s1 = inlined_call_operand.vmem [shape: f32[4,24,1], index: 1, kind: input, shape index: {}]   ;;  %s4291_s2 = inlined_call_operand.vmem [shape: f32[24,1], index: 2, kind: input, shape index: {}]   ;;  %s4292_s3 = inlined_call_operand.vmem [shape: f32[4,128,50], index: 3, kind: input, shape index: {}]   ;;  %s4293_s4 = inlined_call_operand.vmem [shape: f32[40,96], index: 4, kind: input, shape index: {}]   ;;  %s4294_s5 = inlined_call_operand.vmem [shape: f32[40,1], index: 5, kind: input, shape index: {}]   ;;  %s4295_s6 = inlined_call_operand.vmem [shape: f32[3,50,20], index: 6, kind: input, shape index: {}]   ;;  %s4296_s7 = inlined_call_operand.vmem [shape: f32[3,20,8], index: 7, kind: input, shape index: {}]   ;;  %s4297_s8 = inlined_call_operand.vmem [shape: f32[4,8,2], index: 8, kind: input, shape index: {}]   ;;  %s4298_s9 = inlined_call_operand.vmem [shape: f32[10,160], index: 9, kind: input, shape index: {}]   ;;  %s4299_s10 = inlined_call_operand.vmem [shape: f32[10,1], index: 10, kind: input, shape index: {}]   ;;  %s4300_s11 = inlined_call_operand.vmem [shape: f32[3,10,2], index: 11, kind: output, shape index: {}]  }
   0x1 LB: > { %s2396_s18 = sadd.s32 4294967295, %s3374_s17   ;;  %p2400_p0 = scmp.ge.s32.totalorder %s3374_s17, 1  ;;  %s3374_s17 = sphi %s3440_s17, %s21_s17  }
   0x2   : > { %p337_p1 = scmp.lt.s32.totalorder %s3374_s17, 4 }
   0x4   : > { %p338_p2 = pnand %p2400_p0, %p337_p1 }
   0x5   : > { %v2410_v0 = vld [vmem:[%s4290_s1 + $0x30] sm:$0xff] (!%p338_p2)  ;;  %v390_v1 = vld [vmem:[%s4290_s1] sm:$0xff] (!%p338_p2)  ;;  %v3376_v2 = vmov (!%p338_p2), 0   ;;  %v2414_v3 = vld [vmem:[%s4290_s1 + $0x48] sm:$0xff] (!%p338_p2)  ;;  %v3377_v5 = vmov (!%p338_p2), 0.0|0.0   ;;  %vm3378_vm0 = vmmov (!%p338_p2), 0  }
   0x6   : > { %341 = sbr.rel (%p338_p2) target bundleno = 1594 (0x63a), region = 64  ;;  %3367 = vset.pattern.permute.xlu1 (!%p338_p2), %v3376_v2  ;;  %3366 = vset.pattern.permute.xlu0 (!%p338_p2), %v3376_v2  ;;  %v2406_v4 = vld [vmem:[%s4290_s1 + $0x18] sm:$0xff] (!%p338_p2)  ;;  %v391_v6 = vld [vmem:[%s4290_s1 + $0x8] sm:$0xff] (!%p338_p2)  ;;  %v387_v7 = vld [vmem:[%s4291_s2] sm:$0xff] (!%p338_p2)  ;;  %v3379_v58 = vmov (!%p338_p2), 0.0   ;;  %p377_p3 = scmp.lt.s32.totalorder (!%p338_p2), %s2396_s18, 2 }
   0x7   : > { %453 = vperm.xlu1 (!%p338_p2), %3367, %v2410_v0   ;;  %396 = vperm.xlu0 (!%p338_p2), %3366, %v390_v1   ;;  %v677_v8 = vld [vmem:[%s4292_s3] sm:$0xff] (!%p338_p2)  ;;  %v678_v9 = vld [vmem:[%s4292_s3 + $0x8] sm:$0xff] (!%p338_p2)  ;;  %v679_v13 = vld [vmem:[%s4292_s3 + $0x10] sm:$0xff] (!%p338_p2)  ;;  %vm1099_vm1 = vcmask (!%p338_p2), 785408   ;;  %vm1233_vm2 = vcmask (!%p338_p2), 1041408   ;;  %vm1217_vm3 = vcmask (!%p338_p2), 408576  }
   0x8   : > { %3166 = vmatprep.subr.bf16.mxu0 (!%p338_p2), %v3377_v5  ;;  %3190 = vmatprep.subr.bf16.mxu1 (!%p338_p2), %v3377_v5  ;;  %v3167_v10 = vpack.c.bf16 (!%p338_p2), %v678_v9, %v677_v8  ;;  %v2430_v11 = vld [vmem:[%s4292_s3 + $0x80] sm:$0xff] (!%p338_p2)  ;;  %v2431_v12 = vld [vmem:[%s4292_s3 + $0x88] sm:$0xff] (!%p338_p2)  ;;  %v680_v15 = vld [vmem:[%s4292_s3 + $0x18] sm:$0xff] (!%p338_p2)  ;;  %vm1558_vm4 = vcmask (!%p338_p2), 1043456   ;;  %vm1542_vm5 = vcmask (!%p338_p2), 162816   ;;  %vm1857_vm6 = vcmask (!%p338_p2), 64512  }
   0x9   : > { %v3191_v14 = vpack.c.bf16 (!%p338_p2), %v2431_v12, %v2430_v11  ;;  %v2432_v16 = vld [vmem:[%s4292_s3 + $0x90] sm:$0xff] (!%p338_p2)  ;;  %v2433_v17 = vld [vmem:[%s4292_s3 + $0x98] sm:$0xff] (!%p338_p2)  ;;  %v2407_v19 = vld [vmem:[%s4290_s1 + $0x20] sm:$0xff] (!%p338_p2)  ;;  %v3170_v20 = vpack.c.bf16 (!%p338_p2), %v680_v15, %v679_v13  ;;  %2777 = vmatprep.mubr.msk.f32.mxu0 (!%p338_p2), %vm3378_vm0, %v3379_v58  ;;  %2818 = vmatprep.mubr.msk.f32.mxu1 (!%p338_p2), %vm3378_vm0, %v3379_v58  ;;  %vm2255_vm7 = vcmask (!%p338_p2), 261120   ;;  %vm2337_vm8 = vcmask (!%p338_p2), 15360  }
   0xa   : > { %v2411_v18 = vld [vmem:[%s4290_s1 + $0x38] sm:$0xff] (!%p338_p2)  ;;  %3168 = vmatpush3.bf16.msra.mxu0 (!%p338_p2), %v3167_v10  ;;  %v3194_v21 = vpack.c.bf16 (!%p338_p2), %v2433_v17, %v2432_v16  ;;  %v681_v22 = vld [vmem:[%s4292_s3 + $0x20] sm:$0xff] (!%p338_p2)  ;;  %v682_v23 = vld [vmem:[%s4292_s3 + $0x28] sm:$0xff] (!%p338_p2)  ;;  %vm2339_vm9 = vcmask (!%p338_p2), 9216  }
   0xb   : > { %483 = vperm.xlu1 (!%p338_p2), %3367, %v2414_v3   ;;  %423 = vperm.xlu0 (!%p338_p2), %3366, %v2406_v4   ;;  %v2434_v24 = vld [vmem:[%s4292_s3 + $0xa0] sm:$0xff] (!%p338_p2)  ;;  %v2435_v25 = vld [vmem:[%s4292_s3 + $0xa8] sm:$0xff] (!%p338_p2)  ;;  %v392_v27 = vld [vmem:[%s4290_s1 + $0x10] sm:$0xff] (!%p338_p2)  ;;  %v3173_v28 = vpack.c.bf16 (!%p338_p2), %v682_v23, %v681_v22 }
   0xc   : > { %3192 = vmatpush3.bf16.msra.mxu1 (!%p338_p2), %v3191_v14  ;;  %3169 = vmatprep.subr.bf16.mxu0 (!%p338_p2), %v3377_v5  ;;  %v2408_v26 = vld [vmem:[%s4290_s1 + $0x28] sm:$0xff] (!%p338_p2)  ;;  %v3197_v29 = vpack.c.bf16 (!%p338_p2), %v2435_v25, %v2434_v24  ;;  %v683_v30 = vld [vmem:[%s4292_s3 + $0x30] sm:$0xff] (!%p338_p2)  ;;  %v684_v31 = vld [vmem:[%s4292_s3 + $0x38] sm:$0xff] (!%p338_p2) }
   0xd   : > { %3193 = vmatprep.subr.bf16.mxu1 %v3377_v5  ;;  %v2436_v32 = vld [vmem:[%s4292_s3 + $0xb0] sm:$0xff]  ;;  %v2437_v33 = vld [vmem:[%s4292_s3 + $0xb8] sm:$0xff]  ;;  %v2412_v34 = vld [vmem:[%s4290_s1 + $0x40] sm:$0xff]  ;;  %v3176_v36 = vpack.c.bf16 %v684_v31, %v683_v30  ;;  %s4302_s18 = smov (!%p377_p3, %s2396_s18), 2 }
   0xe   : > { %3171 = vmatpush3.bf16.msra.mxu0 %v3170_v20  ;;  %v2415_v35 = vld [vmem:[%s4290_s1 + $0x50] sm:$0xff]  ;;  %v3200_v37 = vpack.c.bf16 %v2437_v33, %v2436_v32  ;;  %v685_v38 = vld [vmem:[%s4292_s3 + $0x40] sm:$0xff]  ;;  %v686_v39 = vld [vmem:[%s4292_s3 + $0x48] sm:$0xff]  ;;  %s2566_s25 = sshll.u32 %s4302_s18, 4 }
   0xf   : > { %401 = vperm.xlu1 %3367, %v391_v6   ;;  %508 = vperm.xlu0 %3366, %v387_v7   ;;  %v2438_v40 = vld [vmem:[%s4292_s3 + $0xc0] sm:$0xff]  ;;  %v2439_v41 = vld [vmem:[%s4292_s3 + $0xc8] sm:$0xff]  ;;  %v2416_v43 = vld [vmem:[%s4290_s1 + $0x58] sm:$0xff]  ;;  %v3179_v44 = vpack.c.bf16 %v686_v39, %v685_v38  ;;  %s3644_s28 = scalar_lea.vmem %s4289_s0, %s2566_s25  ;;  %s386_s20 = scalar_lea.vmem %s4300_s11, %s2566_s25 }
  0x10   : > { %3195 = vmatpush3.bf16.msra.mxu1 %v3194_v21  ;;  %3172 = vmatprep.subr.bf16.mxu0 %v3377_v5  ;;  %v388_v42 = vld [vmem:[%s4291_s2 + $0x8] sm:$0xff]  ;;  %v3203_v45 = vpack.c.bf16 %v2439_v41, %v2438_v40  ;;  %v687_v46 = vld [vmem:[%s4292_s3 + $0x50] sm:$0xff]  ;;  %v688_v47 = vld [vmem:[%s4292_s3 + $0x58] sm:$0xff] }
  0x11   : > { %3196 = vmatprep.subr.bf16.mxu1 %v3377_v5  ;;  %v2440_v48 = vld [vmem:[%s4292_s3 + $0xd0] sm:$0xff]  ;;  %v2441_v49 = vld [vmem:[%s4292_s3 + $0xd8] sm:$0xff]  ;;  %v1069_v50 = vld [vmem:[%s4294_s5] sm:$0xff]  ;;  %v3182_v52 = vpack.c.bf16 %v688_v47, %v687_v46 }
  0x12   : > { %3174 = vmatpush3.bf16.msra.mxu0 %v3173_v28  ;;  %v389_v51 = vld [vmem:[%s4291_s2 + $0x10] sm:$0xff]  ;;  %v3206_v53 = vpack.c.bf16 %v2441_v49, %v2440_v48  ;;  %v689_v54 = vld [vmem:[%s4292_s3 + $0x60] sm:$0xff]  ;;  %v690_v55 = vld [vmem:[%s4292_s3 + $0x68] sm:$0xff] }
  0x13   : > { %458 = vperm.xlu1 %3367, %v2411_v18   ;;  %428 = vperm.xlu0 %3366, %v2407_v19   ;;  %v2442_v56 = vld [vmem:[%s4292_s3 + $0xe0] sm:$0xff]  ;;  %v2443_v57 = vld [vmem:[%s4292_s3 + $0xe8] sm:$0xff]  ;;  %v1071_v59 = vld [vmem:[%s4294_s5 + $0x10] sm:$0xff]  ;;  %v3185_v61 = vpack.c.bf16 %v690_v55, %v689_v54 }
  0x14   : > { %3198 = vmatpush3.bf16.msra.mxu1 %v3197_v29  ;;  %3175 = vmatprep.subr.bf16.mxu0 %v3377_v5  ;;  %v1070_v60 = vld [vmem:[%s4294_s5 + $0x8] sm:$0xff]  ;;  %v3209_v62 = vpack.c.bf16 %v2443_v57, %v2442_v56  ;;  %v691_v63 = vld [vmem:[%s4292_s3 + $0x70] sm:$0xff]  ;;  %v692_v0 = vld [vmem:[%s4292_s3 + $0x78] sm:$0xff] }
  0x15   : > { %3199 = vmatprep.subr.bf16.mxu1 %v3377_v5  ;;  %v2444_v1 = vld [vmem:[%s4292_s3 + $0xf0] sm:$0xff]  ;;  %v2445_v2 = vld [vmem:[%s4292_s3 + $0xf8] sm:$0xff]  ;;  %v1073_v3 = vld [vmem:[%s4294_s5 + $0x20] sm:$0xff]  ;;  %v3188_v6 = vpack.c.bf16 %v692_v0, %v691_v63 }
  0x16   : > { %3177 = vmatpush3.bf16.msra.mxu0 %v3176_v36  ;;  %v1072_v4 = vld [vmem:[%s4294_s5 + $0x18] sm:$0xff]  ;;  %v3212_v7 = vpack.c.bf16 %v2445_v2, %v2444_v1  ;;  %v2244_v8 = vld [vmem:[%s4299_s10 + $0x8] sm:$0x3]  ;;  %v2243_v9 = vld [vmem:[%s4299_s10] sm:$0xff] }
  0x17   : > { %433 = vperm.xlu1 %3367, %v2408_v26   ;;  %406 = vperm.xlu0 %3366, %v392_v27   ;;  %v3649_v10 = vld [vmem:[%s4292_s3 + $0x100] sm:$0xff]  ;;  %v3654_v11 = vld [vmem:[%s4292_s3 + $0x108] sm:$0xff]  ;;  %v3675_v18 = vld [vmem:[%s4292_s3 + $0x110] sm:$0xff] }
  0x18   : > { %3201 = vmatpush3.bf16.msra.mxu1 %v3200_v37  ;;  %3178 = vmatprep.subr.bf16.mxu0 %v3377_v5  ;;  %v3657_v14 = vld [vmem:[%s3644_s28] ss:$0 sm:$0xff]  ;;  %v3660_v15 = vld [vmem:[%s3644_s28 + $0x4] ss:$0 sm:$0xff]  ;;  %v3670_v17 = vld [vmem:[%s4292_s3 + $0x188] sm:$0xff] }
  0x19   : > { %3202 = vmatprep.subr.bf16.mxu1 %v3377_v5  ;;  %v3665_v16 = vld [vmem:[%s4292_s3 + $0x180] sm:$0xff]  ;;  %v3680_v19 = vld [vmem:[%s4292_s3 + $0x118] sm:$0xff]  ;;  %v3685_v20 = vld [vmem:[%s4292_s3 + $0x190] sm:$0xff] }
  0x1a   : > { %3180 = vmatpush3.bf16.msra.mxu0 %v3179_v44  ;;  %v3690_v21 = vld [vmem:[%s4292_s3 + $0x198] sm:$0xff]  ;;  %v3693_v22 = vld [vmem:[%s3644_s28 + $0x2] ss:$0 sm:$0xff]  ;;  %v3696_v23 = vld [vmem:[%s3644_s28 + $0x8] ss:$0 sm:$0xff]  ;;  %v3218_v36 = vpack.c.bf16 %v3680_v19, %v3675_v18 }
  0x1b   : > { %463 = vperm.xlu1 %3367, %v2412_v34   ;;  %488 = vperm.xlu0 %3366, %v2415_v35   ;;  %v3699_v24 = vld [vmem:[%s3644_s28 + $0xc] ss:$0 sm:$0xff]  ;;  %v3702_v25 = vld [vmem:[%s3644_s28 + $0x1] ss:$0 sm:$0xff]  ;;  %v3705_v26 = vld [vmem:[%s3644_s28 + $0x5] ss:$0 sm:$0xff]  ;;  %v3215_v34 = vpack.c.bf16 %v3654_v11, %v3649_v10  ;;  %v3239_v35 = vpack.c.bf16 %v3670_v17, %v3665_v16  ;;  %v3242_v37 = vpack.c.bf16 %v3690_v21, %v3685_v20 }
  0x1c   : > { %3204 = vmatpush3.bf16.msra.mxu1 %v3203_v45  ;;  %3181 = vmatprep.subr.bf16.mxu0 %v3377_v5  ;;  %v3708_v27 = vld [vmem:[%s3644_s28 + $0x9] ss:$0 sm:$0xff]  ;;  %v3711_v28 = vld [vmem:[%s3644_s28 + $0xd] ss:$0 sm:$0xff]  ;;  %v3714_v29 = vld [vmem:[%s3644_s28 + $0x6] ss:$0 sm:$0xff] }
  0x1d   : > { %3205 = vmatprep.subr.bf16.mxu1 %v3377_v5  ;;  %v3717_v30 = vld [vmem:[%s3644_s28 + $0xa] ss:$0 sm:$0xff]  ;;  %v3720_v31 = vld [vmem:[%s3644_s28 + $0xe] ss:$0 sm:$0xff]  ;;  %v3741_v44 = vld [vmem:[%s3644_s28 + $0xb] ss:$0 sm:$0xff] }
  0x1e   : > { %3183 = vmatpush3.bf16.msra.mxu0 %v3182_v52  ;;  %v3744_v45 = vld [vmem:[%s3644_s28 + $0xf] ss:$0 sm:$0xff]  ;;  %v2466_v16 = vld [vmem:[%s4292_s3 + $0x1a0] sm:$0xff]  ;;  %v2453_v18 = vld [vmem:[%s4292_s3 + $0x138] sm:$0xff] }
  0x1f   : > { %513 = vperm.xlu1 %3367, %v388_v42   ;;  %493 = vperm.xlu0 %3366, %v2416_v43   ;;  %v3735_v42 = vld [vmem:[%s3644_s28 + $0x3] ss:$0 sm:$0xff]  ;;  %v3738_v43 = vld [vmem:[%s3644_s28 + $0x7] ss:$0 sm:$0xff]  ;;  %v2451_v11 = vld [vmem:[%s4292_s3 + $0x128] sm:$0xff] }
  0x20   : > { %3207 = vmatpush3.bf16.msra.mxu1 %v3206_v53  ;;  %3184 = vmatprep.subr.bf16.mxu0 %v3377_v5  ;;  %v2467_v17 = vld [vmem:[%s4292_s3 + $0x1a8] sm:$0xff]  ;;  %v2468_v19 = vld [vmem:[%s4292_s3 + $0x1b0] sm:$0xff]  ;;  %v2469_v20 = vld [vmem:[%s4292_s3 + $0x1b8] sm:$0xff] }
  0x21   : > { %3208 = vmatprep.subr.bf16.mxu1 %v3377_v5 }
  0x22   : > { %3186 = vmatpush3.bf16.msra.mxu0 %v3185_v61 }
  0x23   : > { %1076 = vperm.xlu1 %3367, %v1069_v50   ;;  %518 = vperm.xlu0 %3366, %v389_v51  }
  0x24   : > { %3210 = vmatpush3.bf16.msra.mxu1 %v3209_v62  ;;  %3187 = vmatprep.subr.bf16.mxu0 %v3377_v5 }
  0x25   : > { %3211 = vmatprep.subr.bf16.mxu1 %v3377_v5 }
  0x26   : > { %3189 = vmatpush3.bf16.msra.mxu0 %v3188_v6 }
  0x27   : > { %1086 = vperm.xlu1 %3367, %v1071_v59   ;;  %1081 = vperm.xlu0 %3366, %v1070_v60  }
  0x28   : > { %3213 = vmatpush3.bf16.msra.mxu1 %v3212_v7  ;;  %3214 = vmatprep.subr.bf16.mxu0 %v3377_v5 }
  0x29   : > { %3238 = vmatprep.subr.bf16.mxu1 %v3377_v5 }
  0x2b   : > { %1096 = vperm.xlu1 %3367, %v1073_v3   ;;  %1091 = vperm.xlu0 %3366, %v1072_v4  }
  0x2f   : > { %2252 = vperm.xlu1 %3367, %v2244_v8   ;;  %2247 = vperm.xlu0 %3366, %v2243_v9  }
  0x86   : > { %v454_v12 = vpop.permute.xlu1 %453  ;;  %v397_v13 = vpop.permute.xlu0 %396 }
  0x87   : > { %v413_v38 = vmul.f32 %v3657_v14, %v397_v13  ;;  %v532_v39 = vmul.f32 %v3660_v15, %v397_v13  ;;  %v582_v40 = vmul.f32 %v3696_v23, %v397_v13  ;;  %v632_v41 = vmul.f32 %v3699_v24, %v397_v13 }
  0x88   : > { %v470_v50 = vmul.f32 %v3693_v22, %v454_v12  ;;  %v551_v51 = vmul.f32 %v3714_v29, %v454_v12  ;;  %v601_v52 = vmul.f32 %v3717_v30, %v454_v12  ;;  %v651_v53 = vmul.f32 %v3720_v31, %v454_v12 }
  0x8a   : > { %v484_v32 = vpop.permute.xlu1 %483  ;;  %v424_v33 = vpop.permute.xlu0 %423 }
  0x8b   : > { %v440_v46 = vmul.f32 %v3702_v25, %v424_v33  ;;  %v540_v47 = vmul.f32 %v3705_v26, %v424_v33  ;;  %v590_v48 = vmul.f32 %v3708_v27, %v424_v33  ;;  %v640_v49 = vmul.f32 %v3711_v28, %v424_v33 }
  0x8c   : > { %v500_v61 = vmul.f32 %v3735_v42, %v484_v32  ;;  %v562_v62 = vmul.f32 %v3738_v43, %v484_v32  ;;  %v612_v63 = vmul.f32 %v3741_v44, %v484_v32  ;;  %v662_v0 = vmul.f32 %v3744_v45, %v484_v32 }
  0x8d   : > { %v443_v54 = vadd.f32 %v440_v46, %v413_v38  ;;  %v543_v55 = vadd.f32 %v540_v47, %v532_v39  ;;  %v593_v56 = vadd.f32 %v590_v48, %v582_v40  ;;  %v643_v57 = vadd.f32 %v640_v49, %v632_v41 }
  0x8e   : > { %v402_v59 = vpop.permute.xlu1 %401  ;;  %v509_v60 = vpop.permute.xlu0 %508 }
  0x8f   : > { %v473_v1 = vadd.f32 %v470_v50, %v443_v54  ;;  %v554_v2 = vadd.f32 %v551_v51, %v543_v55  ;;  %v604_v3 = vadd.f32 %v601_v52, %v593_v56  ;;  %v654_v4 = vadd.f32 %v651_v53, %v643_v57 }
  0x90   : > { %v414_v6 = vmul.f32 %v3657_v14, %v402_v59  ;;  %v533_v7 = vmul.f32 %v3660_v15, %v402_v59  ;;  %v583_v8 = vmul.f32 %v3696_v23, %v402_v59  ;;  %v633_v9 = vmul.f32 %v3699_v24, %v402_v59 }
  0x91   : > { %v503_v12 = vadd.f32 %v500_v61, %v473_v1  ;;  %v565_v13 = vadd.f32 %v562_v62, %v554_v2  ;;  %v615_v33 = vadd.f32 %v612_v63, %v604_v3  ;;  %v665_v38 = vadd.f32 %v662_v0, %v654_v4 }
  0x92   : > { %v459_v39 = vpop.permute.xlu1 %458  ;;  %v429_v40 = vpop.permute.xlu0 %428 }
  0x93   : > { %v471_v32 = vmul.f32 %v3693_v22, %v459_v39  ;;  %v552_v41 = vmul.f32 %v3714_v29, %v459_v39  ;;  %v602_v46 = vmul.f32 %v3717_v30, %v459_v39  ;;  %v652_v47 = vmul.f32 %v3720_v31, %v459_v39 }
  0x94   : > { %v521_v48 = vadd.f32 %v509_v60, %v503_v12  ;;  %v568_v49 = vadd.f32 %v565_v13, %v509_v60  ;;  %v618_v50 = vadd.f32 %v615_v33, %v509_v60  ;;  %v668_v51 = vadd.f32 %v665_v38, %v509_v60 }
  0x95   : > { %v441_v52 = vmul.f32 %v3702_v25, %v429_v40  ;;  %v541_v53 = vmul.f32 %v3705_v26, %v429_v40  ;;  %v591_v54 = vmul.f32 %v3708_v27, %v429_v40  ;;  %v641_v55 = vmul.f32 %v3711_v28, %v429_v40 }
  0x96   : > { %v524_v56 = vmax.f32 %v521_v48, 0.0  ;;  %v571_v57 = vmax.f32 %v568_v49, 0.0  ;;  %v621_v59 = vmax.f32 %v618_v50, 0.0  ;;  %v671_v61 = vmax.f32 %v668_v51, 0.0  ;;  %v434_v62 = vpop.permute.xlu1 %433  ;;  %v407_v63 = vpop.permute.xlu0 %406 }
  0x97   : > { %v444_v0 = vadd.f32 %v441_v52, %v414_v6  ;;  %v544_v1 = vadd.f32 %v541_v53, %v533_v7  ;;  %v594_v2 = vadd.f32 %v591_v54, %v583_v8  ;;  %v644_v3 = vadd.f32 %v641_v55, %v633_v9 }
  0x98   : > { %v574_v4 = vmax.f32 %v524_v56, %v571_v57  ;;  %v442_v60 = vmul.f32 %v3702_v25, %v434_v62  ;;  %v542_v12 = vmul.f32 %v3705_v26, %v434_v62  ;;  %v592_v13 = vmul.f32 %v3708_v27, %v434_v62 }
  0x99   : > { %v642_v33 = vmul.f32 %v3711_v28, %v434_v62  ;;  %v415_v38 = vmul.f32 %v3657_v14, %v407_v63  ;;  %v534_v39 = vmul.f32 %v3660_v15, %v407_v63  ;;  %v584_v40 = vmul.f32 %v3696_v23, %v407_v63 }
  0x9a   : > { %v624_v48 = vmax.f32 %v574_v4, %v621_v59  ;;  %v634_v6 = vmul.f32 %v3699_v24, %v407_v63  ;;  %v464_v7 = vpop.permute.xlu1 %463  ;;  %v489_v8 = vpop.permute.xlu0 %488  ;;  %v474_v9 = vadd.f32 %v471_v32, %v444_v0  ;;  %v555_v49 = vadd.f32 %v552_v41, %v544_v1 }
  0x9b   : > { %v445_v25 = vadd.f32 %v442_v60, %v415_v38  ;;  %v545_v50 = vadd.f32 %v542_v12, %v534_v39  ;;  %v595_v26 = vadd.f32 %v592_v13, %v584_v40  ;;  %v472_v27 = vmul.f32 %v3693_v22, %v464_v7 }
  0x9c   : > { %v645_v51 = vadd.f32 %v642_v33, %v634_v6  ;;  %v553_v28 = vmul.f32 %v3714_v29, %v464_v7  ;;  %v603_v14 = vmul.f32 %v3717_v30, %v464_v7  ;;  %v653_v15 = vmul.f32 %v3720_v31, %v464_v7  ;;  %v2452_v7 = vld [vmem:[%s4292_s3 + $0x130] sm:$0xff] }
  0x9d   : > { %v475_v23 = vadd.f32 %v472_v27, %v445_v25  ;;  %v501_v52 = vmul.f32 %v3735_v42, %v489_v8  ;;  %v563_v24 = vmul.f32 %v3738_v43, %v489_v8  ;;  %v613_v32 = vmul.f32 %v3741_v44, %v489_v8  ;;  %v2454_v27 = vld [vmem:[%s4292_s3 + $0x140] sm:$0xff] }
  0x9e   : > { %v556_v41 = vadd.f32 %v553_v28, %v545_v50  ;;  %v606_v53 = vadd.f32 %v603_v14, %v595_v26  ;;  %v656_v54 = vadd.f32 %v653_v15, %v645_v51  ;;  %v663_v55 = vmul.f32 %v3744_v45, %v489_v8  ;;  %v514_v22 = vpop.permute.xlu1 %513  ;;  %v494_v56 = vpop.permute.xlu0 %493  ;;  %v2455_v14 = vld [vmem:[%s4292_s3 + $0x148] sm:$0xff]  ;;  %v2470_v15 = vld [vmem:[%s4292_s3 + $0x1c0] sm:$0xff] }
  0x9f   : > { %v3786_v57 = vmax.f32 %v624_v48, %v671_v61  ;;  %v504_v29 = vadd.f32 %v501_v52, %v474_v9  ;;  %v566_v30 = vadd.f32 %v563_v24, %v555_v49  ;;  %v605_v59 = vadd.f32 %v602_v46, %v594_v2 }
  0xa0   : > { %v655_v31 = vadd.f32 %v652_v47, %v644_v3  ;;  %v502_v62 = vmul.f32 %v3735_v42, %v494_v56  ;;  %v564_v63 = vmul.f32 %v3738_v43, %v494_v56  ;;  %v614_v0 = vmul.f32 %v3741_v44, %v494_v56  ;;  %v2450_v47 = vld [vmem:[%s4292_s3 + $0x120] sm:$0xff] }
  0xa1   : > { %2778 = vmatmul.mubr.f32.vlgmr.msra.gmra.mrb[0].mxu0 %v3786_v57  ;;  %2819 = vmatmul.mubr.f32.vlgmr.msra.gmra.mrb[0].mxu1 %v3786_v57  ;;  %v522_v1 = vadd.f32 %v514_v22, %v504_v29  ;;  %v569_v4 = vadd.f32 %v566_v30, %v514_v22  ;;  %v616_v60 = vadd.f32 %v613_v32, %v605_v59  ;;  %v2458_v29 = vld [vmem:[%s4292_s3 + $0x160] sm:$0xff]  ;;  %v2459_v30 = vld [vmem:[%s4292_s3 + $0x168] sm:$0xff] }
  0xa2   : > { %3216 = vmatpush3.bf16.msra.mxu0 %v3215_v34  ;;  %3240 = vmatpush3.bf16.msra.mxu1 %v3239_v35  ;;  %v666_v42 = vadd.f32 %v663_v55, %v655_v31  ;;  %v664_v43 = vmul.f32 %v3744_v45, %v494_v56  ;;  %v519_v46 = vpop.permute.xlu0 %518  ;;  %v505_v44 = vadd.f32 %v502_v62, %v475_v23  ;;  %v2471_v23 = vld [vmem:[%s4292_s3 + $0x1c8] sm:$0xff]  ;;  %v2473_v55 = vld [vmem:[%s4292_s3 + $0x1d8] sm:$0xff]  ;;  %v2474_v59 = vld [vmem:[%s4292_s3 + $0x1e0] sm:$0xff] }
  0xa3   : > { %v525_v61 = vmax.f32 %v522_v1, 0.0  ;;  %v572_v2 = vmax.f32 %v569_v4, 0.0  ;;  %v619_v3 = vadd.f32 %v616_v60, %v514_v22  ;;  %3217 = vmatprep.subr.bf16.mxu0 %v3377_v5  ;;  %3241 = vmatprep.subr.bf16.mxu1 %v3377_v5  ;;  %v567_v10 = vadd.f32 %v564_v63, %v556_v41  ;;  %v2456_v41 = vld [vmem:[%s4292_s3 + $0x150] sm:$0xff]  ;;  %v2475_v31 = vld [vmem:[%s4292_s3 + $0x1e8] sm:$0xff]  ;;  %v2461_v1 = vld [vmem:[%s4292_s3 + $0x178] sm:$0xff] }
  0xa4   : > { %v669_v34 = vadd.f32 %v666_v42, %v514_v22  ;;  %v523_v35 = vadd.f32 %v519_v46, %v505_v44  ;;  %v617_v45 = vadd.f32 %v614_v0, %v606_v53  ;;  %v667_v12 = vadd.f32 %v664_v43, %v656_v54  ;;  %2780 = vmatprep.mubr.msk.f32.mxu0 %vm3378_vm0, %v3379_v58  ;;  %v2457_v53 = vld [vmem:[%s4292_s3 + $0x158] sm:$0xff]  ;;  %v2472_v54 = vld [vmem:[%s4292_s3 + $0x1d0] sm:$0xff] }
  0xa5   : > { %v575_v13 = vmax.f32 %v525_v61, %v572_v2  ;;  %v622_v33 = vmax.f32 %v619_v3, 0.0  ;;  %v570_v38 = vadd.f32 %v567_v10, %v519_v46  ;;  %2821 = vmatprep.mubr.msk.f32.mxu1 %vm3378_vm0, %v3379_v58  ;;  %v3221_v48 = vpack.c.bf16 %v2451_v11, %v2450_v47  ;;  %v2460_v0 = vld [vmem:[%s4292_s3 + $0x170] sm:$0xff]  ;;  %v2477_v60 = vld [vmem:[%s4292_s3 + $0x1f8] sm:$0xff]  ;;  %v1214_v3 = vld [vmem:[%s4295_s6 + $0x20] sm:$0xff] }
  0xa6   : > { %3219 = vmatpush3.bf16.msra.mxu0 %v3218_v36  ;;  %3243 = vmatpush3.bf16.msra.mxu1 %v3242_v37  ;;  %v526_v39 = vmax.f32 %v523_v35, 0.0  ;;  %v620_v40 = vadd.f32 %v617_v45, %v519_v46  ;;  %v3245_v6 = vpack.c.bf16 %v2467_v17, %v2466_v16  ;;  %v672_v9 = vmax.f32 %v669_v34, 0.0  ;;  %v2476_v4 = vld [vmem:[%s4292_s3 + $0x1f0] sm:$0xff]  ;;  %v1213_v61 = vld [vmem:[%s4295_s6 + $0x18] sm:$0xff]  ;;  %v1215_v10 = vld [vmem:[%s4295_s6 + $0x28] sm:$0xff] }
  0xa7   : > { %v625_v8 = vmax.f32 %v575_v13, %v622_v33  ;;  %v573_v49 = vmax.f32 %v570_v38, 0.0  ;;  %v670_v25 = vadd.f32 %v667_v12, %v519_v46  ;;  %3220 = vmatprep.subr.bf16.mxu0 %v3377_v5  ;;  %3244 = vmatprep.subr.bf16.mxu1 %v3377_v5  ;;  %v3224_v50 = vpack.c.bf16 %v2453_v18, %v2452_v7  ;;  %v1211_v46 = vld [vmem:[%s4295_s6 + $0x8] sm:$0xff]  ;;  %v1212_v47 = vld [vmem:[%s4295_s6 + $0x10] sm:$0xff] }
  0xa8   : > { %v623_v36 = vmax.f32 %v620_v40, 0.0  ;;  %v3248_v26 = vpack.c.bf16 %v2469_v20, %v2468_v19  ;;  %v3227_v24 = vpack.c.bf16 %v2455_v14, %v2454_v27  ;;  %v3251_v32 = vpack.c.bf16 %v2471_v23, %v2470_v15  ;;  %v2502_v15 = vld [vmem:[%s4295_s6 + $0x70] sm:$0xff]  ;;  %v2503_v23 = vld [vmem:[%s4295_s6 + $0x78] sm:$0xff] }
  0xa9   : > { %v576_v21 = vmax.f32 %v526_v39, %v573_v49  ;;  %v3838_v37 = vmax.f32 %v625_v8, %v672_v9  ;;  %v673_v28 = vmax.f32 %v670_v25, 0.0  ;;  %v3230_v22 = vpack.c.bf16 %v2457_v53, %v2456_v41  ;;  %v2505_v41 = vld [vmem:[%s4295_s6 + $0x88] sm:$0xff] }
  0xaa   : > { %3222 = vmatpush3.bf16.msra.mxu0 %v3221_v48  ;;  %3246 = vmatpush3.bf16.msra.mxu1 %v3245_v6  ;;  %v3254_v56 = vpack.c.bf16 %v2473_v55, %v2472_v54  ;;  %v3233_v62 = vpack.c.bf16 %v2459_v30, %v2458_v29  ;;  %v3257_v63 = vpack.c.bf16 %v2475_v31, %v2474_v59  ;;  %v1065_v53 = vld [vmem:[%s4293_s4 + $0x8] sm:$0xff]  ;;  %v1066_v55 = vld [vmem:[%s4293_s4 + $0x10] sm:$0xff]  ;;  %v2507_v30 = vld [vmem:[%s4295_s6 + $0x98] sm:$0xff] }
  0xab   : > { %v626_v51 = vmax.f32 %v576_v21, %v623_v36  ;;  %3223 = vmatprep.subr.bf16.mxu0 %v3377_v5  ;;  %3247 = vmatprep.subr.bf16.mxu1 %v3377_v5  ;;  %v3236_v42 = vpack.c.bf16 %v2461_v1, %v2460_v0  ;;  %v3260_v43 = vpack.c.bf16 %v2477_v60, %v2476_v4  ;;  %v2506_v29 = vld [vmem:[%s4295_s6 + $0x90] sm:$0xff]  ;;  %v2490_v0 = vld [vmem:[%s4295_s6 + $0x40] sm:$0xff]  ;;  %v1077_v1 = vpop.permute.xlu1 %1076 }
  0xac   : > { %2781 = vmatmul.mubr.f32.gmra.mrb[2].mxu0 %v3838_v37  ;;  %2822 = vmatmul.mubr.f32.gmra.mrb[2].mxu1 %v3838_v37  ;;  %v3284_v2 = vpack.c.bf16 %v1213_v61, %v1212_v47  ;;  %v3287_v11 = vpack.c.bf16 %v1215_v10, %v1214_v3  ;;  %v4009_v59 = vpack.c.bf16 %v2507_v30, %v2506_v29  ;;  %v1216_v31 = vld [vmem:[%s4295_s6 + $0x30] sm:$0x3]  ;;  %v1082_v47 = vpop.permute.xlu0 %1081 }
  0xad   : > { %2783 = vmatprep.mubr.msk.f32.mxu0 %vm3378_vm0, %v3379_v58  ;;  %2824 = vmatprep.mubr.msk.f32.mxu1 %vm3378_vm0, %v3379_v58  ;;  %v676_v52 = vmax.f32 %v626_v51, %v673_v28 }
  0xae   : > { %3225 = vmatpush3.bf16.msra.mxu0 %v3224_v50  ;;  %3249 = vmatpush3.bf16.msra.mxu1 %v3248_v26 }
  0xaf   : > { %3226 = vmatprep.subr.bf16.mxu0 %v3377_v5  ;;  %3250 = vmatprep.subr.bf16.mxu1 %v3377_v5 }
  0xb0   : > { %2784 = vmatmul.mubr.f32.gmra.mrb[4].mxu0 %v676_v52  ;;  %2825 = vmatmul.mubr.f32.gmra.mrb[4].mxu1 %v676_v52 }
  0xb1   : > { %2859 = vmatprep.mubr.msk.f32.mxu0 %vm3378_vm0, %v3379_v58  ;;  %2900 = vmatprep.mubr.msk.f32.mxu1 %vm3378_vm0, %v3379_v58 }
  0xb2   : > { %3228 = vmatpush3.bf16.msra.mxu0 %v3227_v24  ;;  %3252 = vmatpush3.bf16.msra.mxu1 %v3251_v32  ;;  %v3961_v24 = vpack.c.bf16 %v2503_v23, %v2502_v15  ;;  %v2504_v32 = vld [vmem:[%s4295_s6 + $0x80] sm:$0xff] }
  0xb3   : > { %3229 = vmatprep.subr.bf16.mxu0 %v3377_v5  ;;  %3253 = vmatprep.subr.bf16.mxu1 %v3377_v5  ;;  %v3977_v54 = vpack.c.bf16 %v2505_v41, %v2504_v32 }
  0xb6   : > { %3231 = vmatpush3.bf16.msra.mxu0 %v3230_v22  ;;  %3255 = vmatpush3.bf16.msra.mxu1 %v3254_v56  ;;  %v1067_v22 = vld [vmem:[%s4293_s4 + $0x18] sm:$0xff]  ;;  %v1068_v56 = vld [vmem:[%s4293_s4 + $0x20] sm:$0xff] }
  0xb7   : > { %3232 = vmatprep.subr.bf16.mxu0 %v3377_v5  ;;  %3256 = vmatprep.subr.bf16.mxu1 %v3377_v5 }
  0xba   : > { %3234 = vmatpush3.bf16.msra.mxu0 %v3233_v62  ;;  %3258 = vmatpush3.bf16.msra.mxu1 %v3257_v63  ;;  %v4021_v62 = vld [vmem:[%s4295_s6 + $0xa0] sm:$0x3]  ;;  %v2489_v63 = vld [vmem:[%s4295_s6 + $0x38] sm:$0xff] }
  0xbb   : > { %3235 = vmatprep.subr.bf16.mxu0 %v3377_v5  ;;  %3259 = vmatprep.subr.bf16.mxu1 %v3377_v5 }
  0xbe   : > { %3237 = vmatpush3.bf16.msra.mxu0 %v3236_v42  ;;  %3261 = vmatpush3.bf16.msra.mxu1 %v3260_v43  ;;  %v3290_v43 = vpack.c.bf16 %v2490_v0, %v2489_v63 }
  0xbf   : > { %3262 = vmatprep.subr.bf16.mxu0 %v3377_v5  ;;  %3280 = vmatprep.subr.bf16.mxu1 %v3377_v5 }
  0xc1   : > { %2860 = vmatmul.mubr.f32.vlgmr.msra.gmra.mrb[6].mxu0 %v3786_v57  ;;  %2901 = vmatmul.mubr.f32.vlgmr.msra.gmra.mrb[6].mxu1 %v3786_v57  ;;  %v1210_v57 = vld [vmem:[%s4295_s6] sm:$0xff] }
  0xc2   : > { %2862 = vmatprep.mubr.msk.f32.mxu0 %vm3378_vm0, %v3379_v58  ;;  %2903 = vmatprep.mubr.msk.f32.mxu1 %vm3378_vm0, %v3379_v58  ;;  %v3281_v44 = vpack.c.bf16 %v1211_v46, %v1210_v57  ;;  %v2491_v46 = vld [vmem:[%s4295_s6 + $0x48] sm:$0xff] }
  0xc4   : > { %3282 = vmatpush3.bf16.msra.mxu1 %v3281_v44  ;;  %v2492_v44 = vld [vmem:[%s4295_s6 + $0x50] sm:$0xff] }
  0xc5   : > { %2863 = vmatmul.mubr.f32.gmra.mrb[8].mxu0 %v3838_v37  ;;  %2904 = vmatmul.mubr.f32.gmra.mrb[8].mxu1 %v3838_v37  ;;  %v3293_v10 = vpack.c.bf16 %v2492_v44, %v2491_v46  ;;  %v2532_v44 = vld [vmem:[%s4296_s7 + $0x40] sm:$0xf] }
  0xc6   : > { %2865 = vmatprep.mubr.msk.f32.mxu0 %vm3378_vm0, %v3379_v58  ;;  %2906 = vmatprep.mubr.msk.f32.mxu1 %vm3378_vm0, %v3379_v58 }
  0xc7   : > { %3283 = vmatprep.subr.bf16.mxu1 %v3377_v5 }
  0xc8   : > { %3285 = vmatpush3.bf16.msra.mxu1 %v3284_v2 }
  0xc9   : > { %2866 = vmatmul.mubr.f32.gmra.mrb[10].mxu0 %v676_v52  ;;  %2907 = vmatmul.mubr.f32.gmra.mrb[10].mxu1 %v676_v52  ;;  %v1064_v52 = vld [vmem:[%s4293_s4] sm:$0xff] }
  0xca   : > { %2933 = vmatprep.mubr.msk.f32.mxu0 %vm3378_vm0, %v3379_v58  ;;  %2962 = vmatprep.mubr.msk.f32.mxu1 %vm3378_vm0, %v3379_v58 }
  0xcb   : > { %3286 = vmatprep.subr.bf16.mxu1 %v3377_v5 }
  0xcc   : > { %3288 = vmatpush3.bf16.msra.mxu1 %v3287_v11 }
  0xcd   : > { %2960 = vmatprep.subr.mxu1 %v3379_v58 }
  0xd0   : > { %2961 = vmatpush3.msk.msra.mxu1 %vm1233_vm2, %v1216_v31  ;;  %v2530_v31 = vld [vmem:[%s4296_s7 + $0x30] sm:$0xff] }
  0xd1   : > { %3289 = vmatprep.subr.bf16.mxu1 %v3377_v5 }
 0x174   : > { %v759_v16 = vpop.f32.mrb[0].mxu0  ;;  %v856_v17 = vpop.f32.mrb[0].mxu1 }
 0x175   : > { %v2779_v34 = vpop.f32.mrb[1].mxu0  ;;  %v2820_v35 = vpop.f32.mrb[1].mxu1 }
 0x176   : > { %v1087_v34 = vpop.permute.xlu1 %1086 }
 0x17f   : > { %v764_v45 = vpop.f32.mrb[2].mxu0  ;;  %v861_v12 = vpop.f32.mrb[2].mxu1 }
 0x180   : > { %v3263_v13 = vpack.c.bf16 %v764_v45, %v759_v16  ;;  %v2782_v33 = vpop.f32.mrb[3].mxu0  ;;  %v2823_v38 = vpop.f32.mrb[3].mxu1  ;;  %v2493_v16 = vld [vmem:[%s4295_s6 + $0x58] sm:$0xff] }
 0x181   : > { %v1092_v38 = vpop.permute.xlu0 %1091 }
 0x182   : > { %3264 = vmatpush3.bf16.msra.mxu0 %v3263_v13 }
 0x183   : > { %v769_v39 = vpop.f32.mrb[4].mxu0  ;;  %v866_v40 = vpop.f32.mrb[4].mxu1  ;;  %3265 = vmatprep.subr.bf16.mxu0 %v3377_v5 }
 0x184   : > { %v3266_v48 = vpack.c.bf16 %v856_v17, %v769_v39  ;;  %v3269_v6 = vpack.c.bf16 %v866_v40, %v861_v12  ;;  %v2785_v7 = vpop.f32.mrb[5].mxu0  ;;  %v2826_v8 = vpop.f32.mrb[5].mxu1  ;;  %v2494_v17 = vld [vmem:[%s4295_s6 + $0x60] sm:$0xff] }
 0x185   : > { %v3296_v13 = vpack.c.bf16 %v2494_v17, %v2493_v16  ;;  %v2495_v7 = vld [vmem:[%s4295_s6 + $0x68] sm:$0x3]  ;;  %v1097_v8 = vpop.permute.xlu1 %1096 }
 0x186   : > { %3267 = vmatpush3.bf16.msra.mxu0 %v3266_v48 }
 0x187   : > { %3268 = vmatprep.subr.bf16.mxu0 %v3377_v5 }
 0x18a   : > { %3270 = vmatpush3.bf16.msra.mxu0 %v3269_v6 }
 0x18b   : > { %3271 = vmatprep.subr.bf16.mxu0 %v3377_v5 }
 0x194   : > { %v953_v9 = vpop.f32.mrb[6].mxu0  ;;  %v1050_v49 = vpop.f32.mrb[6].mxu1 }
 0x195   : > { %v2861_v25 = vpop.f32.mrb[7].mxu0  ;;  %v2902_v18 = vpop.f32.mrb[7].mxu1 }
 0x198   : > { %v958_v19 = vpop.f32.mrb[8].mxu0  ;;  %v1055_v20 = vpop.f32.mrb[8].mxu1 }
 0x199   : > { %v3272_v21 = vpack.c.bf16 %v958_v19, %v953_v9  ;;  %v2864_v36 = vpop.f32.mrb[9].mxu0  ;;  %v2905_v37 = vpop.f32.mrb[9].mxu1  ;;  %v1539_v19 = vld [vmem:[%s4296_s7] sm:$0xff] }
 0x19a   : > { %v2522_v37 = vld [vmem:[%s4296_s7 + $0x20] sm:$0xff] }
 0x19b   : > { %3273 = vmatpush3.bf16.msra.mxu0 %v3272_v21  ;;  %v2521_v21 = vld [vmem:[%s4296_s7 + $0x18] sm:$0xff] }
 0x19c   : > { %v963_v50 = vpop.f32.mrb[10].mxu0  ;;  %v1060_v26 = vpop.f32.mrb[10].mxu1  ;;  %3274 = vmatprep.subr.bf16.mxu0 %v3377_v5 }
 0x19d   : > { %v3275_v27 = vpack.c.bf16 %v1050_v49, %v963_v50  ;;  %v3278_v51 = vpack.c.bf16 %v1060_v26, %v1055_v20  ;;  %v2867_v28 = vpop.f32.mrb[11].mxu0  ;;  %v2908_v14 = vpop.f32.mrb[11].mxu1  ;;  %v1540_v20 = vld [vmem:[%s4296_s7 + $0x8] sm:$0xff]  ;;  %v3311_v50 = vpack.c.bf16 %v2522_v37, %v2521_v21  ;;  %v1541_v26 = vld [vmem:[%s4296_s7 + $0x10] sm:$0xf] }
 0x19e   : > { %v3308_v36 = vpack.c.bf16 %v1540_v20, %v1539_v19 }
 0x19f   : > { %3276 = vmatpush3.bf16.msra.mxu0 %v3275_v27  ;;  %v2523_v27 = vld [vmem:[%s4296_s7 + $0x28] sm:$0xf] }
 0x1a0   : > { %3277 = vmatprep.subr.bf16.mxu0 %v3377_v5 }
 0x1a3   : > { %3279 = vmatpush3.bf16.msra.mxu0 %v3278_v51 }
 0x1a4   : > { %3298 = vmatprep.subr.bf16.mxu0 %v3377_v5 }
 0x1a6   : > { %2934 = vmatmul.mubr.msk.f32.vlgmr.msra.gmra.mrb[12].mxu0 %vm1099_vm1, %v1064_v52 }
 0x1a7   : > { %2936 = vmatprep.mubr.msk.f32.mxu0 %vm3378_vm0, %v3379_v58  ;;  %3300 = vmatpush3.bf16.msra.mxu0 %v3961_v24 }
 0x1a8   : > { %3301 = vmatprep.subr.bf16.mxu0 %v3377_v5 }
 0x1aa   : > { %2937 = vmatmul.mubr.msk.f32.gmra.mrb[14].mxu0 %vm1099_vm1, %v1065_v53 }
 0x1ab   : > { %2939 = vmatprep.mubr.msk.f32.mxu0 %vm3378_vm0, %v3379_v58  ;;  %3303 = vmatpush3.bf16.msra.mxu0 %v3977_v54 }
 0x1ac   : > { %3304 = vmatprep.subr.bf16.mxu0 %v3377_v5 }
 0x1ae   : > { %2940 = vmatmul.mubr.msk.f32.gmra.mrb[16].mxu0 %vm1099_vm1, %v1066_v55 }
 0x1af   : > { %2942 = vmatprep.mubr.msk.f32.mxu0 %vm3378_vm0, %v3379_v58  ;;  %3306 = vmatpush3.bf16.msra.mxu0 %v4009_v59 }
 0x1b0   : > { %3018 = vmatprep.subr.mxu0 %v3379_v58 }
 0x1b2   : > { %2943 = vmatmul.mubr.msk.f32.gmra.mrb[18].mxu0 %vm1099_vm1, %v1067_v22 }
 0x1b3   : > { %2945 = vmatprep.mubr.msk.f32.mxu0 %vm3378_vm0, %v3379_v58  ;;  %3019 = vmatpush3.msk.msra.mxu0 %vm1233_vm2, %v4021_v62 }
 0x1b4   : > { %3310 = vmatprep.subr.bf16.mxu0 %v3377_v5 }
 0x1b6   : > { %2946 = vmatmul.mubr.msk.f32.gmra.mrb[20].mxu0 %vm1099_vm1, %v1068_v56 }
 0x1b7   : > { %3020 = vmatprep.mubr.msk.f32.mxu0 %vm3378_vm0, %v3379_v58 }
 0x279   : > { %v1181_v4 = vpop.f32.mrb[12].mxu0 }
 0x27a   : > { %v1182_v60 = vadd.f32 %v1181_v4, %v1077_v1  ;;  %v2935_v42 = vpop.f32.mrb[13].mxu0 }
 0x27c   : > { %v1205_v57 = vmax.f32 %v1182_v60, 0.0 }
 0x27d   : > { %v1186_v61 = vpop.f32.mrb[14].mxu0 }
 0x27e   : > { %v1187_v2 = vadd.f32 %v1186_v61, %v1082_v47  ;;  %v2938_v3 = vpop.f32.mrb[15].mxu0  ;;  %2963 = vmatmul.mubr.msk.f32.vlgmr.msra.gmra.mrb[12].mxu1 %vm1217_vm3, %v1205_v57  ;;  %3021 = vmatmul.mubr.msk.f32.vlgmr.msra.gmra.mrb[22].mxu0 %vm1217_vm3, %v1205_v57 }
 0x27f   : > { %3291 = vmatpush3.bf16.msra.mxu1 %v3290_v43  ;;  %2965 = vmatprep.mubr.msk.f32.mxu1 %vm3378_vm0, %v3379_v58 }
 0x280   : > { %v1206_v11 = vmax.f32 %v1187_v2, 0.0  ;;  %3023 = vmatprep.mubr.msk.f32.mxu0 %vm3378_vm0, %v3379_v58  ;;  %3292 = vmatprep.subr.bf16.mxu1 %v3377_v5 }
 0x281   : > { %v1191_v35 = vpop.f32.mrb[16].mxu0  ;;  %3312 = vmatpush3.bf16.msra.mxu0 %v3311_v50 }
 0x282   : > { %v1192_v45 = vadd.f32 %v1191_v35, %v1087_v34  ;;  %v2941_v12 = vpop.f32.mrb[17].mxu0  ;;  %2966 = vmatmul.mubr.msk.f32.gmra.mrb[14].mxu1 %vm1217_vm3, %v1206_v11  ;;  %3024 = vmatmul.mubr.msk.f32.gmra.mrb[24].mxu0 %vm1217_vm3, %v1206_v11 }
 0x283   : > { %3294 = vmatpush3.bf16.msra.mxu1 %v3293_v10  ;;  %2968 = vmatprep.mubr.msk.f32.mxu1 %vm3378_vm0, %v3379_v58 }
 0x284   : > { %v1207_v33 = vmax.f32 %v1192_v45, 0.0  ;;  %3026 = vmatprep.mubr.msk.f32.mxu0 %vm3378_vm0, %v3379_v58  ;;  %3295 = vmatprep.subr.bf16.mxu1 %v3377_v5 }
 0x285   : > { %v1196_v39 = vpop.f32.mrb[18].mxu0  ;;  %3060 = vmatprep.subr.mxu0 %v3379_v58 }
 0x286   : > { %v1197_v40 = vadd.f32 %v1196_v39, %v1092_v38  ;;  %v2944_v48 = vpop.f32.mrb[19].mxu0  ;;  %2969 = vmatmul.mubr.msk.f32.gmra.mrb[16].mxu1 %vm1217_vm3, %v1207_v33  ;;  %3027 = vmatmul.mubr.msk.f32.gmra.mrb[26].mxu0 %vm1217_vm3, %v1207_v33  ;;  %v1856_v39 = vld [vmem:[%s4297_s8] sm:$0xff] }
 0x287   : > { %3297 = vmatpush3.bf16.msra.mxu1 %v3296_v13  ;;  %2971 = vmatprep.mubr.msk.f32.mxu1 %vm3378_vm0, %v3379_v58 }
 0x288   : > { %v1208_v6 = vmax.f32 %v1197_v40, 0.0  ;;  %2989 = vmatprep.subr.mxu1 %v3379_v58  ;;  %3062 = vmatprep.mubr.msk.f32.mxu0 %vm3378_vm0, %v3379_v58  ;;  %v2544_v40 = vld [vmem:[%s4297_s8 + $0x8] sm:$0xff] }
 0x289   : > { %v1201_v9 = vpop.f32.mrb[20].mxu0  ;;  %3061 = vmatpush3.msk.msra.mxu0 %vm1558_vm4, %v2523_v27 }
 0x28a   : > { %v1202_v49 = vadd.f32 %v1201_v9, %v1097_v8  ;;  %v2947_v25 = vpop.f32.mrb[21].mxu0  ;;  %2972 = vmatmul.mubr.msk.f32.gmra.mrb[18].mxu1 %vm1217_vm3, %v1208_v6  ;;  %3098 = vmatprep.subr.mxu0 %v3379_v58 }
 0x28b   : > { %2974 = vmatprep.mubr.msk.f32.mxu1 %vm3378_vm0, %v3379_v58  ;;  %2990 = vmatpush3.msk.msra.mxu1 %vm1233_vm2, %v2495_v7 }
 0x28c   : > { %v1209_v18 = vmax.f32 %v1202_v49, 0.0  ;;  %3346 = vmatprep.subr.bf16.mxu1 %v3377_v5 }
 0x28e   : > { %2975 = vmatmul.mubr.msk.f32.gmra.mrb[20].mxu1 %vm1217_vm3, %v1209_v18 }
 0x28f   : > { %2991 = vmatprep.mubr.msk.f32.mxu1 %vm3378_vm0, %v3379_v58 }
 0x292   : > { %2992 = vmatmul.mubr.msk.f32.vlgmr.msra.gmra.mrb[22].mxu1 %vm1217_vm3, %v1205_v57 }
 0x293   : > { %3350 = vmatpush3.bf16.msra.mxu1 %v3961_v24  ;;  %2994 = vmatprep.mubr.msk.f32.mxu1 %vm3378_vm0, %v3379_v58 }
 0x294   : > { %3347 = vmatprep.subr.bf16.mxu1 %v3377_v5 }
 0x296   : > { %2995 = vmatmul.mubr.msk.f32.gmra.mrb[24].mxu1 %vm1217_vm3, %v1206_v11 }
 0x297   : > { %3351 = vmatpush3.bf16.msra.mxu1 %v3977_v54  ;;  %2997 = vmatprep.mubr.msk.f32.mxu1 %vm3378_vm0, %v3379_v58 }
 0x298   : > { %3348 = vmatprep.subr.bf16.mxu1 %v3377_v5 }
 0x29a   : > { %2998 = vmatmul.mubr.msk.f32.gmra.mrb[26].mxu1 %vm1217_vm3, %v1207_v33 }
 0x29b   : > { %3352 = vmatpush3.bf16.msra.mxu1 %v4009_v59  ;;  %3000 = vmatprep.mubr.msk.f32.mxu1 %vm3378_vm0, %v3379_v58 }
 0x29c   : > { %3349 = vmatprep.subr.mxu1 %v3379_v58 }
 0x29e   : > { %3001 = vmatmul.mubr.msk.f32.gmra.mrb[28].mxu1 %vm1217_vm3, %v1208_v6 }
 0x29f   : > { %3003 = vmatprep.mubr.msk.f32.mxu1 %vm3378_vm0, %v3379_v58  ;;  %3353 = vmatpush3.msk.msra.mxu1 %vm1233_vm2, %v4021_v62  ;;  %v2531_v62 = vld [vmem:[%s4296_s7 + $0x38] sm:$0xff] }
 0x2a0   : > { %3307 = vmatprep.subr.bf16.mxu1 %v3377_v5  ;;  %v3314_v4 = vpack.c.bf16 %v2531_v62, %v2530_v31 }
 0x2a2   : > { %3004 = vmatmul.mubr.msk.f32.gmra.mrb[30].mxu1 %vm1217_vm3, %v1209_v18 }
 0x2a3   : > { %3029 = vmatprep.mubr.msk.f32.mxu1 %vm3378_vm0, %v3379_v58 }
 0x2a6   : > { %3030 = vmatmul.mubr.msk.f32.vlgmr.msra.gmra.mrb[32].mxu1 %vm1217_vm3, %v1208_v6 }
 0x2a7   : > { %3032 = vmatprep.mubr.msk.f32.mxu1 %vm3378_vm0, %v3379_v58  ;;  %3309 = vmatpush3.bf16.msra.mxu1 %v3308_v36 }
 0x2a8   : > { %3039 = vmatprep.subr.mxu1 %v3379_v58 }
 0x2aa   : > { %3033 = vmatmul.mubr.msk.f32.gmra.mrb[34].mxu1 %vm1217_vm3, %v1209_v18 }
 0x2ab   : > { %3041 = vmatprep.mubr.msk.f32.mxu1 %vm3378_vm0, %v3379_v58  ;;  %3040 = vmatpush3.msk.msra.mxu1 %vm1558_vm4, %v1541_v26 }
 0x2ac   : > { %3313 = vmatprep.subr.bf16.mxu1 %v3377_v5 }
 0x351   : > { %v1303_v51 = vpop.f32.mrb[12].mxu1  ;;  %v1510_v28 = vpop.f32.mrb[22].mxu0 }
 0x352   : > { %v2964_v14 = vpop.f32.mrb[13].mxu1  ;;  %v3022_v15 = vpop.f32.mrb[23].mxu0 }
 0x355   : > { %v1308_v23 = vpop.f32.mrb[14].mxu1  ;;  %v1515_v52 = vpop.f32.mrb[24].mxu0 }
 0x356   : > { %v2967_v24 = vpop.f32.mrb[15].mxu1  ;;  %v3025_v32 = vpop.f32.mrb[25].mxu0 }
 0x359   : > { %v1313_v41 = vpop.f32.mrb[16].mxu1  ;;  %v1520_v53 = vpop.f32.mrb[26].mxu0 }
 0x35a   : > { %v2970_v54 = vpop.f32.mrb[17].mxu1  ;;  %v3028_v55 = vpop.f32.mrb[27].mxu0 }
 0x35d   : > { %v1318_v22 = vpop.f32.mrb[18].mxu1 }
 0x35e   : > { %v2973_v56 = vpop.f32.mrb[19].mxu1 }
 0x35f   : > { %v2556_v56 = vld [vmem:[%s4297_s8 + $0x18] sm:$0xff] }
 0x361   : > { %v1323_v29 = vpop.f32.mrb[20].mxu1 }
 0x362   : > { %v2976_v30 = vpop.f32.mrb[21].mxu1 }
 0x365   : > { %v1404_v59 = vpop.f32.mrb[22].mxu1 }
 0x366   : > { %v1428_v63 = vmax.f32 %v1303_v51, %v1404_v59  ;;  %v2993_v0 = vpop.f32.mrb[23].mxu1 }
 0x368   : > { %v1534_v1 = vmax.f32 %v1428_v63, %v1510_v28 }
 0x369   : > { %v1409_v60 = vpop.f32.mrb[24].mxu1 }
 0x36a   : > { %v1429_v42 = vmax.f32 %v1308_v23, %v1409_v60  ;;  %v2996_v43 = vpop.f32.mrb[25].mxu1  ;;  %3042 = vmatmul.mubr.msk.f32.vlgmr.msra.gmra.mrb[36].mxu1 %vm1542_vm5, %v1534_v1  ;;  %3063 = vmatmul.mubr.msk.f32.vlgmr.msra.gmra.mrb[28].mxu0 %vm1542_vm5, %v1534_v1 }
 0x36b   : > { %3044 = vmatprep.mubr.msk.f32.mxu1 %vm3378_vm0, %v3379_v58  ;;  %3065 = vmatprep.mubr.msk.f32.mxu0 %vm3378_vm0, %v3379_v58 }
 0x36c   : > { %v1535_v57 = vmax.f32 %v1429_v42, %v1515_v52  ;;  %3315 = vmatpush3.bf16.msra.mxu1 %v3314_v4  ;;  %3099 = vmatpush3.msra.mxu0 %v1856_v39 }
 0x36d   : > { %v1414_v46 = vpop.f32.mrb[26].mxu1  ;;  %3081 = vmatprep.subr.mxu1 %v3379_v58  ;;  %3132 = vmatprep.subr.mxu0 %v3379_v58 }
 0x36e   : > { %v1430_v47 = vmax.f32 %v1313_v41, %v1414_v46  ;;  %v2999_v61 = vpop.f32.mrb[27].mxu1  ;;  %3045 = vmatmul.mubr.msk.f32.gmra.mrb[38].mxu1 %vm1542_vm5, %v1535_v57  ;;  %3066 = vmatmul.mubr.msk.f32.gmra.mrb[30].mxu0 %vm1542_vm5, %v1535_v57 }
 0x36f   : > { %3047 = vmatprep.mubr.msk.f32.mxu1 %vm3378_vm0, %v3379_v58  ;;  %3068 = vmatprep.mubr.msk.f32.mxu0 %vm3378_vm0, %v3379_v58 }
 0x370   : > { %v1536_v2 = vmax.f32 %v1430_v47, %v1520_v53  ;;  %3082 = vmatpush3.msk.msra.mxu1 %vm1558_vm4, %v2532_v44 }
 0x371   : > { %v1419_v3 = vpop.f32.mrb[28].mxu1  ;;  %3115 = vmatprep.subr.mxu1 %v3379_v58 }
 0x372   : > { %v1431_v10 = vmax.f32 %v1318_v22, %v1419_v3  ;;  %v3002_v11 = vpop.f32.mrb[29].mxu1  ;;  %3048 = vmatmul.mubr.msk.f32.gmra.mrb[40].mxu1 %vm1542_vm5, %v1536_v2  ;;  %3069 = vmatmul.mubr.msk.f32.gmra.mrb[32].mxu0 %vm1542_vm5, %v1536_v2  ;;  %v2550_v22 = vld [vmem:[%s4297_s8 + $0x10] sm:$0xff] }
 0x373   : > { %3050 = vmatprep.mubr.msk.f32.mxu1 %vm3378_vm0, %v3379_v58  ;;  %3071 = vmatprep.mubr.msk.f32.mxu0 %vm3378_vm0, %v3379_v58 }
 0x375   : > { %v1424_v16 = vpop.f32.mrb[30].mxu1 }
 0x376   : > { %v1432_v17 = vmax.f32 %v1323_v29, %v1424_v16  ;;  %v3005_v34 = vpop.f32.mrb[31].mxu1 }
 0x379   : > { %v1525_v35 = vpop.f32.mrb[32].mxu1 }
 0x37a   : > { %v1537_v45 = vmax.f32 %v1431_v10, %v1525_v35  ;;  %v3031_v12 = vpop.f32.mrb[33].mxu1 }
 0x37c   : > { %3051 = vmatmul.mubr.msk.f32.gmra.mrb[42].mxu1 %vm1542_vm5, %v1537_v45  ;;  %3072 = vmatmul.mubr.msk.f32.gmra.mrb[34].mxu0 %vm1542_vm5, %v1537_v45 }
 0x37d   : > { %v1530_v13 = vpop.f32.mrb[34].mxu1  ;;  %3053 = vmatprep.mubr.msk.f32.mxu1 %vm3378_vm0, %v3379_v58  ;;  %3074 = vmatprep.mubr.msk.f32.mxu0 %vm3378_vm0, %v3379_v58 }
 0x37e   : > { %v1538_v33 = vmax.f32 %v1432_v17, %v1530_v13  ;;  %v3034_v38 = vpop.f32.mrb[35].mxu1 }
 0x380   : > { %3054 = vmatmul.mubr.msk.f32.gmra.mrb[44].mxu1 %vm1542_vm5, %v1538_v33  ;;  %3075 = vmatmul.mubr.msk.f32.gmra.mrb[36].mxu0 %vm1542_vm5, %v1538_v33 }
 0x381   : > { %3083 = vmatprep.mubr.msk.f32.mxu1 %vm3378_vm0, %v3379_v58  ;;  %3100 = vmatprep.mubr.msk.f32.mxu0 %vm3378_vm0, %v3379_v58 }
 0x384   : > { %3084 = vmatmul.mubr.msk.f32.vlgmr.msra.gmra.mrb[46].mxu1 %vm1542_vm5, %v1534_v1 }
 0x385   : > { %3086 = vmatprep.mubr.msk.f32.mxu1 %vm3378_vm0, %v3379_v58  ;;  %3116 = vmatpush3.msra.mxu1 %v2544_v40 }
 0x386   : > { %3149 = vmatprep.subr.mxu1 %v3379_v58 }
 0x388   : > { %3087 = vmatmul.mubr.msk.f32.gmra.mrb[48].mxu1 %vm1542_vm5, %v1535_v57  ;;  %v2240_v57 = vld [vmem:[%s4298_s9 + $0x8] sm:$0xff] }
 0x389   : > { %3089 = vmatprep.mubr.msk.f32.mxu1 %vm3378_vm0, %v3379_v58 }
 0x38c   : > { %3090 = vmatmul.mubr.msk.f32.gmra.mrb[50].mxu1 %vm1542_vm5, %v1536_v2 }
 0x38d   : > { %3092 = vmatprep.mubr.msk.f32.mxu1 %vm3378_vm0, %v3379_v58 }
 0x390   : > { %3093 = vmatmul.mubr.msk.f32.gmra.mrb[52].mxu1 %vm1542_vm5, %v1537_v45 }
 0x391   : > { %3095 = vmatprep.mubr.msk.f32.mxu1 %vm3378_vm0, %v3379_v58 }
 0x394   : > { %3096 = vmatmul.mubr.msk.f32.gmra.mrb[54].mxu1 %vm1542_vm5, %v1538_v33 }
 0x395   : > { %3117 = vmatprep.mubr.msk.f32.mxu1 %vm3378_vm0, %v3379_v58 }
 0x43d   : > { %v1628_v48 = vpop.f32.mrb[36].mxu1  ;;  %v1725_v6 = vpop.f32.mrb[28].mxu0 }
 0x43e   : > { %v1749_v7 = vmax.f32 %v1628_v48, %v1725_v6  ;;  %v3043_v8 = vpop.f32.mrb[37].mxu1  ;;  %v3064_v9 = vpop.f32.mrb[29].mxu0 }
 0x441   : > { %v1633_v49 = vpop.f32.mrb[38].mxu1  ;;  %v1730_v25 = vpop.f32.mrb[30].mxu0 }
 0x442   : > { %v1750_v18 = vmax.f32 %v1633_v49, %v1730_v25  ;;  %v3046_v19 = vpop.f32.mrb[39].mxu1  ;;  %v3067_v20 = vpop.f32.mrb[31].mxu0 }
 0x445   : > { %v1638_v21 = vpop.f32.mrb[40].mxu1  ;;  %v1735_v36 = vpop.f32.mrb[32].mxu0 }
 0x446   : > { %v1751_v37 = vmax.f32 %v1638_v21, %v1735_v36  ;;  %v3049_v50 = vpop.f32.mrb[41].mxu1  ;;  %v3070_v26 = vpop.f32.mrb[33].mxu0 }
 0x44f   : > { %v1643_v27 = vpop.f32.mrb[42].mxu1  ;;  %v1740_v51 = vpop.f32.mrb[34].mxu0 }
 0x450   : > { %v1752_v28 = vmax.f32 %v1643_v27, %v1740_v51  ;;  %v3052_v14 = vpop.f32.mrb[43].mxu1  ;;  %v3073_v15 = vpop.f32.mrb[35].mxu0 }
 0x453   : > { %v1648_v23 = vpop.f32.mrb[44].mxu1  ;;  %v1745_v52 = vpop.f32.mrb[36].mxu0 }
 0x454   : > { %v1753_v24 = vmax.f32 %v1648_v23, %v1745_v52  ;;  %v3055_v32 = vpop.f32.mrb[45].mxu1  ;;  %v3076_v41 = vpop.f32.mrb[37].mxu0 }
 0x457   : > { %v1827_v53 = vpop.f32.mrb[46].mxu1 }
 0x458   : > { %v1851_v54 = vmax.f32 %v1749_v7, %v1827_v53  ;;  %v3085_v55 = vpop.f32.mrb[47].mxu1 }
 0x45a   : > { %3101 = vmatmul.mubr.msk.f32.vlgmr.msra.gmra.mrb[38].mxu0 %vm1857_vm6, %v1851_v54  ;;  %3118 = vmatmul.mubr.msk.f32.vlgmr.msra.gmra.mrb[56].mxu1 %vm1857_vm6, %v1851_v54 }
 0x45b   : > { %3133 = vmatpush3.msra.mxu0 %v2550_v22  ;;  %v1832_v29 = vpop.f32.mrb[48].mxu1  ;;  %3103 = vmatprep.mubr.msk.f32.mxu0 %vm3378_vm0, %v3379_v58 }
 0x45c   : > { %v1852_v30 = vmax.f32 %v1750_v18, %v1832_v29  ;;  %v3088_v59 = vpop.f32.mrb[49].mxu1  ;;  %3120 = vmatprep.mubr.msk.f32.mxu1 %vm3378_vm0, %v3379_v58  ;;  %3150 = vmatpush3.msra.mxu1 %v2556_v56  ;;  %v2239_v29 = vld [vmem:[%s4298_s9] sm:$0xff] }
 0x45d   : > { %3316 = vmatprep.subr.bf16.mxu0 %v3377_v5  ;;  %v2241_v59 = vld [vmem:[%s4298_s9 + $0x10] sm:$0x3] }
 0x45e   : > { %3104 = vmatmul.mubr.msk.f32.gmra.mrb[40].mxu0 %vm1857_vm6, %v1852_v30  ;;  %3121 = vmatmul.mubr.msk.f32.gmra.mrb[58].mxu1 %vm1857_vm6, %v1852_v30 }
 0x45f   : > { %v1837_v31 = vpop.f32.mrb[50].mxu1  ;;  %3106 = vmatprep.mubr.msk.f32.mxu0 %vm3378_vm0, %v3379_v58  ;;  %3123 = vmatprep.mubr.msk.f32.mxu1 %vm3378_vm0, %v3379_v58 }
 0x460   : > { %v1853_v62 = vmax.f32 %v1751_v37, %v1837_v31  ;;  %v3091_v63 = vpop.f32.mrb[51].mxu1  ;;  %v2248_v31 = vpop.permute.xlu0 %2247 }
 0x462   : > { %3107 = vmatmul.mubr.msk.f32.gmra.mrb[42].mxu0 %vm1857_vm6, %v1853_v62  ;;  %3124 = vmatmul.mubr.msk.f32.gmra.mrb[60].mxu1 %vm1857_vm6, %v1853_v62 }
 0x463   : > { %v1842_v0 = vpop.f32.mrb[52].mxu1  ;;  %3109 = vmatprep.mubr.msk.f32.mxu0 %vm3378_vm0, %v3379_v58  ;;  %3126 = vmatprep.mubr.msk.f32.mxu1 %vm3378_vm0, %v3379_v58 }
 0x464   : > { %v1854_v1 = vmax.f32 %v1752_v28, %v1842_v0  ;;  %v3094_v4 = vpop.f32.mrb[53].mxu1  ;;  %v2253_v0 = vpop.permute.xlu1 %2252 }
 0x466   : > { %3110 = vmatmul.mubr.msk.f32.gmra.mrb[44].mxu0 %vm1857_vm6, %v1854_v1  ;;  %3127 = vmatmul.mubr.msk.f32.gmra.mrb[62].mxu1 %vm1857_vm6, %v1854_v1 }
 0x467   : > { %v1847_v60 = vpop.f32.mrb[54].mxu1  ;;  %3112 = vmatprep.mubr.msk.f32.mxu0 %vm3378_vm0, %v3379_v58  ;;  %3129 = vmatprep.mubr.msk.f32.mxu1 %vm3378_vm0, %v3379_v58 }
 0x468   : > { %v1855_v42 = vmax.f32 %v1753_v24, %v1847_v60  ;;  %v3097_v43 = vpop.f32.mrb[55].mxu1 }
 0x46a   : > { %3113 = vmatmul.mubr.msk.f32.gmra.mrb[46].mxu0 %vm1857_vm6, %v1855_v42  ;;  %3130 = vmatmul.mubr.msk.f32.gmra.mrb[64].mxu1 %vm1857_vm6, %v1855_v42 }
 0x46b   : > { %3134 = vmatprep.mubr.msk.f32.mxu0 %vm3378_vm0, %v3379_v58  ;;  %3151 = vmatprep.mubr.msk.f32.mxu1 %vm3378_vm0, %v3379_v58 }
 0x46e   : > { %3135 = vmatmul.mubr.msk.f32.vlgmr.msra.gmra.mrb[48].mxu0 %vm1857_vm6, %v1851_v54  ;;  %3152 = vmatmul.mubr.msk.f32.vlgmr.msra.gmra.mrb[66].mxu1 %vm1857_vm6, %v1851_v54 }
 0x46f   : > { %3137 = vmatprep.mubr.msk.f32.mxu0 %vm3378_vm0, %v3379_v58  ;;  %3154 = vmatprep.mubr.msk.f32.mxu1 %vm3378_vm0, %v3379_v58 }
 0x472   : > { %3138 = vmatmul.mubr.msk.f32.gmra.mrb[50].mxu0 %vm1857_vm6, %v1852_v30  ;;  %3155 = vmatmul.mubr.msk.f32.gmra.mrb[68].mxu1 %vm1857_vm6, %v1852_v30  ;;  %v2242_v30 = vld [vmem:[%s4298_s9 + $0x18] sm:$0x3] }
 0x473   : > { %3140 = vmatprep.mubr.msk.f32.mxu0 %vm3378_vm0, %v3379_v58  ;;  %3157 = vmatprep.mubr.msk.f32.mxu1 %vm3378_vm0, %v3379_v58 }
 0x476   : > { %3141 = vmatmul.mubr.msk.f32.gmra.mrb[52].mxu0 %vm1857_vm6, %v1853_v62  ;;  %3158 = vmatmul.mubr.msk.f32.gmra.mrb[70].mxu1 %vm1857_vm6, %v1853_v62 }
 0x477   : > { %3143 = vmatprep.mubr.msk.f32.mxu0 %vm3378_vm0, %v3379_v58  ;;  %3160 = vmatprep.mubr.msk.f32.mxu1 %vm3378_vm0, %v3379_v58 }
 0x47a   : > { %3144 = vmatmul.mubr.msk.f32.gmra.mrb[54].mxu0 %vm1857_vm6, %v1854_v1  ;;  %3161 = vmatmul.mubr.msk.f32.gmra.mrb[72].mxu1 %vm1857_vm6, %v1854_v1 }
 0x47b   : > { %3146 = vmatprep.mubr.msk.f32.mxu0 %vm3378_vm0, %v3379_v58  ;;  %3163 = vmatprep.mubr.msk.f32.mxu1 %vm3378_vm0, %v3379_v58 }
 0x47e   : > { %3147 = vmatmul.mubr.msk.f32.gmra.mrb[56].mxu0 %vm1857_vm6, %v1855_v42  ;;  %3164 = vmatmul.mubr.msk.f32.gmra.mrb[74].mxu1 %vm1857_vm6, %v1855_v42 }
 0x47f   : > { %2562 = vmatprep.mubr.msk.f32.mxu0 %vm2255_vm7, %v2240_v57 }
 0x52d   : > { %v1939_v46 = vpop.f32.mrb[38].mxu0  ;;  %v2031_v44 = vpop.f32.mrb[56].mxu1 }
 0x52e   : > { %v3102_v47 = vpop.f32.mrb[39].mxu0  ;;  %v3119_v61 = vpop.f32.mrb[57].mxu1 }
 0x531   : > { %v1944_v2 = vpop.f32.mrb[40].mxu0  ;;  %v2036_v3 = vpop.f32.mrb[58].mxu1 }
 0x532   : > { %v3317_v10 = vpack.c.bf16 %v1944_v2, %v1939_v46  ;;  %v3105_v11 = vpop.f32.mrb[41].mxu0  ;;  %v3122_v58 = vpop.f32.mrb[59].mxu1 }
 0x534   : > { %3318 = vmatpush1.bf16.msra.mxu0 %v3317_v10 }
 0x535   : > { %v1949_v16 = vpop.f32.mrb[42].mxu0  ;;  %v2041_v17 = vpop.f32.mrb[60].mxu1  ;;  %3319 = vmatprep.subr.bf16.mxu0 %v3377_v5 }
 0x536   : > { %v3326_v34 = vpack.c.bf16 %v2041_v17, %v2036_v3  ;;  %v3108_v35 = vpop.f32.mrb[43].mxu0  ;;  %v3125_v45 = vpop.f32.mrb[61].mxu1 }
 0x539   : > { %v1954_v12 = vpop.f32.mrb[44].mxu0  ;;  %v2046_v13 = vpop.f32.mrb[62].mxu1 }
 0x53a   : > { %v3320_v33 = vpack.c.bf16 %v1954_v12, %v1949_v16  ;;  %v3111_v38 = vpop.f32.mrb[45].mxu0  ;;  %v3128_v39 = vpop.f32.mrb[63].mxu1 }
 0x53c   : > { %3321 = vmatpush1.bf16.msra.mxu0 %v3320_v33 }
 0x53d   : > { %v1959_v40 = vpop.f32.mrb[46].mxu0  ;;  %v2051_v48 = vpop.f32.mrb[64].mxu1  ;;  %3322 = vmatprep.subr.bf16.mxu0 %v3377_v5 }
 0x53e   : > { %v3323_v6 = vpack.c.bf16 %v2031_v44, %v1959_v40  ;;  %v3329_v7 = vpack.c.bf16 %v2051_v48, %v2046_v13  ;;  %v3114_v8 = vpop.f32.mrb[47].mxu0  ;;  %v3131_v9 = vpop.f32.mrb[65].mxu1 }
 0x540   : > { %3324 = vmatpush1.bf16.msra.mxu0 %v3323_v6 }
 0x541   : > { %v2123_v49 = vpop.f32.mrb[48].mxu0  ;;  %v2215_v25 = vpop.f32.mrb[66].mxu1  ;;  %3325 = vmatprep.subr.bf16.mxu0 %v3377_v5 }
 0x542   : > { %v3136_v18 = vpop.f32.mrb[49].mxu0  ;;  %v3153_v19 = vpop.f32.mrb[67].mxu1 }
 0x544   : > { %3327 = vmatpush1.bf16.msra.mxu0 %v3326_v34 }
 0x545   : > { %v2128_v20 = vpop.f32.mrb[50].mxu0  ;;  %v2220_v21 = vpop.f32.mrb[68].mxu1  ;;  %3328 = vmatprep.subr.bf16.mxu0 %v3377_v5 }
 0x546   : > { %v3332_v36 = vpack.c.bf16 %v2128_v20, %v2123_v49  ;;  %v3139_v37 = vpop.f32.mrb[51].mxu0  ;;  %v3156_v50 = vpop.f32.mrb[69].mxu1 }
 0x548   : > { %3330 = vmatpush1.bf16.msra.mxu0 %v3329_v7 }
 0x549   : > { %v2133_v26 = vpop.f32.mrb[52].mxu0  ;;  %v2225_v27 = vpop.f32.mrb[70].mxu1  ;;  %3331 = vmatprep.subr.bf16.mxu0 %v3377_v5 }
 0x54a   : > { %v3341_v51 = vpack.c.bf16 %v2225_v27, %v2220_v21  ;;  %v3142_v28 = vpop.f32.mrb[53].mxu0  ;;  %v3159_v14 = vpop.f32.mrb[71].mxu1 }
 0x54c   : > { %3333 = vmatpush1.bf16.msra.mxu0 %v3332_v36 }
 0x54d   : > { %v2138_v15 = vpop.f32.mrb[54].mxu0  ;;  %v2230_v23 = vpop.f32.mrb[72].mxu1  ;;  %3334 = vmatprep.subr.bf16.mxu0 %v3377_v5 }
 0x54e   : > { %v3335_v52 = vpack.c.bf16 %v2138_v15, %v2133_v26  ;;  %v3145_v24 = vpop.f32.mrb[55].mxu0  ;;  %v3162_v32 = vpop.f32.mrb[73].mxu1 }
 0x550   : > { %3336 = vmatpush1.bf16.msra.mxu0 %v3335_v52 }
 0x551   : > { %v2143_v41 = vpop.f32.mrb[56].mxu0  ;;  %v2235_v53 = vpop.f32.mrb[74].mxu1  ;;  %3337 = vmatprep.subr.bf16.mxu0 %v3377_v5 }
 0x552   : > { %v3338_v54 = vpack.c.bf16 %v2215_v25, %v2143_v41  ;;  %v3344_v55 = vpack.c.bf16 %v2235_v53, %v2230_v23  ;;  %v3148_v22 = vpop.f32.mrb[57].mxu0  ;;  %v3165_v56 = vpop.f32.mrb[75].mxu1 }
 0x554   : > { %3339 = vmatpush1.bf16.msra.mxu0 %v3338_v54 }
 0x555   : > { %3340 = vmatprep.subr.bf16.mxu0 %v3377_v5 }
 0x558   : > { %3342 = vmatpush1.bf16.msra.mxu0 %v3341_v51 }
 0x559   : > { %3343 = vmatprep.subr.bf16.mxu0 %v3377_v5 }
 0x55c   : > { %3345 = vmatpush1.bf16.msra.mxu0 %v3344_v55 }
 0x55f   : > { %2327 = vmatmul.mubr.f32.vlgmr.msra.gmra.mrb[58].mxu0 %v2239_v29 }
 0x560   : > { %2563 = vmatprep.mubr.msk.f32.mxu0 %vm2255_vm7, %v2242_v30 }
 0x563   : > { %2332 = vmatmul.mubr.f32.gmra.mrb[60].mxu0 %v2241_v59 }
 0x632   : > { %v2328_v5 = vpop.f32.mrb[58].mxu0 }
 0x633   : > { %v2329_v62 = vadd.f32 %v2328_v5, %v2248_v31  ;;  %v2330_v63 = vpop.f32.mrb[59].mxu0 }
 0x635   : > { %2338 = vst.msk [vmem:[%s386_s20] sm:$0xff] %vm2337_vm8, %v2329_v62 }
 0x636   : > { %v2333_v1 = vpop.f32.mrb[60].mxu0 }
 0x637   : > { %v2334_v4 = vadd.f32 %v2333_v1, %v2253_v0  ;;  %v2335_v60 = vpop.f32.mrb[61].mxu0 }
 0x639   : > { %2340 = vst.msk [vmem:[%s386_s20 + $0x8] sm:$0x3] %vm2339_vm9, %v2334_v4 }
 0x63a PF: > { %s21_s17 = sadd.s32 1, %s3374_s17  }
 0x63b   : > { %p18_p4 = scmp.ge.s32.totalorder %s21_s17, 5  }
 0x63d   :  { %20 = sbr.rel (!%p18_p4) target bundleno = 1 (0x1), region = 107 }

</bundles_post_ra>
